<compile_context>
chip_gen: v6e
topology: v6e:2x2x1
jax: 0.10.0
libtpu: 0.0.40
codegen_flags: <defaults>
</compile_context>

<pallas_src>
import functools

import jax
import jax.numpy as jnp
from jax.experimental import pallas as pl
from jax.experimental.pallas import tpu as pltpu


def _round_up(x, m):
    return (x + m - 1) // m * m


def _head_kernel(x_ref, w_ref, o_ref, acc_ref, *, hw, hw_tile, bt, inv_hw, mask_last):
    # x_ref: (bt, C, hw_tile)   feature-map block
    # w_ref: (kp, C)            padded Linear weight
    # o_ref: (bt, kp, 1)        f32 logits (sublane-oriented; sliced in the wrapper)
    # acc_ref: (bt, kp, 1)      f32 scratch, persists across the spatial grid axis
    t = pl.program_id(1)

    @pl.when(t == 0)
    def _():
        acc_ref[...] = jnp.zeros_like(acc_ref)

    if mask_last:
        # Lanes still in-bounds for this spatial tile (only the edge tile is partial;
        # for interior tiles the comparison is all-true and effectively free).
        valid = hw - t * hw_tile
        lane_ok = jax.lax.broadcasted_iota(jnp.int32, (1, hw_tile), 1) < valid

    w = w_ref[...]
    for b in range(bt):  # static unroll; bt is small
        # Fused pool + linear: (kp, C) @ (C, hw_tile) on the MXU, f32 accumulation.
        part = jnp.dot(w, x_ref[b], preferred_element_type=jnp.float32)
        if mask_last:
            # Out-of-bounds lanes of a partial edge block hold undefined data; zero
            # their contribution in the dot result (exact, since output lane l only
            # depends on input lane l).
            part = jnp.where(lane_ok, part, 0.0)
        acc_ref[b] += jnp.sum(part, axis=1, keepdims=True)  # (kp, 1)

    @pl.when(t == pl.num_programs(1) - 1)
    def _():
        # Scale once at finalize: sum / HW == AdaptiveAvgPool2d((1,1)) + Linear.
        o_ref[...] = (acc_ref[...] * inv_hw).astype(o_ref.dtype)


def discriminator_head(x, w, *, hw_tile=None, bt=None):
    """AdaptiveAvgPool2d((1,1)) + flatten + bias-free Linear, fused in one HBM pass.

    x: (B, C, H, W) backbone feature map (f32 or bf16); w: (num_out, C) Linear weight.
    Returns float32 logits of shape (B, num_out).
    """
    B, C, H, W = x.shape
    num_out, c_w = w.shape
    assert c_w == C
    HW = H * W
    itemsize = jnp.dtype(x.dtype).itemsize

    # --- batch block size ----------------------------------------------------
    if bt is None:
        bt = min(8, max(1, B))
        if B >= 2:
            # Keep >= 2 steps on the "parallel" batch axis so both v7x TCs get work.
            bt = min(bt, pl.cdiv(B, 2))
    bt = max(1, min(int(bt), B))
    num_b_blocks = pl.cdiv(B, bt)
    b_pad = num_b_blocks * bt  # padded batch rows produce garbage logits, sliced off

    # --- lane-dense spatial tile (multiple of 128), target ~8 MiB x-block -----
    hw_ceil = _round_up(HW, 128)
    if hw_tile is None:
        target_bytes = 8 * 1024 * 1024
        lanes = max(128, (target_bytes // (bt * C * itemsize)) // 128 * 128)
        hw_tile = min(hw_ceil, int(lanes))
    hw_tile = min(_round_up(int(hw_tile), 128), hw_ceil)
    num_hw_tiles = pl.cdiv(HW, hw_tile)
    mask_last = (HW % hw_tile) != 0  # partial edge block -> in-kernel lane mask

    # --- weights: pad out_features to a sublane multiple (zero rows ignored) ---
    kp = _round_up(num_out, 8)
    w_pad = jnp.zeros((kp, C), dtype=w.dtype).at[:num_out].set(w)
    if w_pad.dtype != x.dtype:
        w_pad = w_pad.astype(x.dtype)  # tiny tensor; keeps the MXU op homogeneous

    # No pad / transpose of the feature map: reshape is free for NCHW-contiguous x.
    x_flat = x.reshape(B, C, HW)

    # --- VMEM budget from actual buffer sizes (double-buffered inputs) --------
    x_block_bytes = bt * C * hw_tile * itemsize
    w_bytes = kp * C * jnp.dtype(w_pad.dtype).itemsize
    vmem_needed = 2 * x_block_bytes + 2 * w_bytes + 2 * bt * kp * 4 + bt * kp * 4
    vmem_limit = int(min(40 * 1024 * 1024,
                         max(8 * 1024 * 1024, vmem_needed + (2 << 20))))

    kernel = functools.partial(_head_kernel, hw=HW, hw_tile=hw_tile, bt=bt,
                               inv_hw=float(1.0 / HW), mask_last=mask_last)

    out = pl.pallas_call(
        kernel,
        out_shape=jax.ShapeDtypeStruct((b_pad, kp, 1), jnp.float32),
        grid_spec=pltpu.PrefetchScalarGridSpec(
            num_scalar_prefetch=0,
            grid=(num_b_blocks, num_hw_tiles),
            in_specs=[
                pl.BlockSpec((bt, C, hw_tile), lambda bb, t: (bb, 0, t)),
                pl.BlockSpec((kp, C), lambda bb, t: (0, 0)),
            ],
            out_specs=pl.BlockSpec((bt, kp, 1), lambda bb, t: (bb, 0, 0)),
            scratch_shapes=[pltpu.VMEM((bt, kp, 1), jnp.float32)],
        ),
        compiler_params=pltpu.CompilerParams(
            dimension_semantics=("parallel", "arbitrary"),
            vmem_limit_bytes=vmem_limit,
        ),
        cost_estimate=pl.CostEstimate(
            flops=2 * B * num_out * C * HW,
            transcendentals=0,
            bytes_accessed=B * C * HW * itemsize + w_bytes + B * num_out * 4,
        ),
    )(x_flat, w_pad)

    return out[:B, :num_out, 0]


def reference(x, w):
    pooled = jnp.mean(x.astype(jnp.float32), axis=(2, 3))  # AdaptiveAvgPool2d + view
    return pooled @ w.T                                     # Linear(bias=False)


if __name__ == "__main__":
    # Head-faithful shapes: backbone channels = 2048, out_features = 2.
    # HW = 15*15 = 225 is not a multiple of 128, exercising the partial-tile mask.
    B, C, H, W = 2, 2048, 15, 15
    NUM_OUT = 2

    key = jax.random.PRNGKey(0)
    kx, kw = jax.random.split(key)
    x = jax.random.normal(kx, (B, C, H, W), dtype=jnp.float32)
    # default nn.Linear weight scale ~ 1/sqrt(fan_in)
    w = jax.random.normal(kw, (NUM_OUT, C), dtype=jnp.float32) * (1.0 / jnp.sqrt(C))

    ref = reference(x, w)

    # 1) auto tiling: single masked spatial tile, 2 batch blocks (parallel axis >= 2)
    out = jax.block_until_ready(discriminator_head(x, w))
    assert out.shape == (B, NUM_OUT) and out.dtype == jnp.float32
    assert jnp.allclose(out, ref, atol=1e-3, rtol=1e-3), float(jnp.max(jnp.abs(out - ref)))

    # 2) explicit multi-tile + batch-blocked path: 2 HW tiles, second one partial (97 lanes)
    out2 = jax.block_until_ready(discriminator_head(x, w, hw_tile=128, bt=2))
    assert jnp.allclose(out2, ref, atol=1e-3, rtol=1e-3), float(jnp.max(jnp.abs(out2 - ref)))

    # 3) bf16 feature-map path (half the HBM traffic); logits stay float32
    out3 = jax.block_until_ready(discriminator_head(x.astype(jnp.bfloat16), w))
    assert out3.dtype == jnp.float32
    assert jnp.allclose(out3, ref, atol=3e-2, rtol=3e-2), float(jnp.max(jnp.abs(out3 - ref)))

    print("KERNEL_OK")
</pallas_src>

<mosaic_0001>
module attributes {stable_mosaic.version = 11 : i64} {
  func.func @_head_kernel(%arg0: i32, %arg1: i32, %arg2: memref<1x2048x256xf32, #tpu.memory_space<vmem>>, %arg3: memref<8x2048xf32, #tpu.memory_space<vmem>>, %arg4: memref<1x8x1xf32, #tpu.memory_space<vmem>>, %arg5: memref<1x8x1xf32, #tpu.memory_space<vmem>>) attributes {dimension_semantics = [#tpu.dimension_semantics<parallel>, #tpu.dimension_semantics<arbitrary>], iteration_bounds = array<i64: 2, 1>, scalar_prefetch = 0 : i64, scratch_operands = 1 : i64, tpu.core_type = #tpu.core_type<tc>, window_params = [{transform_indices = @transform_0, window_bounds = array<i64: 1, 2048, 256>}, {pipeline_mode = #tpu.pipeline_mode<synchronous>, transform_indices = @transform_1, window_bounds = array<i64: 8, 2048>}, {transform_indices = @transform_2, window_bounds = array<i64: 1, 8, 1>}]} {
    %c0_i32 = arith.constant 0 : i32
    %0 = arith.cmpi eq, %arg1, %c0_i32 : i32
    %1 = arith.extui %0 : i1 to i32
    %c0_i32_0 = arith.constant 0 : i32
    %2 = arith.cmpi ne, %1, %c0_i32_0 : i32
    scf.if %2 {
      %cst_15 = arith.constant 0.000000e+00 : f32
      %27 = vector.broadcast %cst_15 : f32 to vector<1x8x1xf32>
      %c0_16 = arith.constant 0 : index
      %c0_17 = arith.constant 0 : index
      %c0_18 = arith.constant 0 : index
      %28 = vector.load %arg5[%c0_16, %c0_17, %c0_18] : memref<1x8x1xf32, #tpu.memory_space<vmem>>, vector<1x8x1xf32>
      tpu.vector_store %arg5[%c0_16, %c0_17, %c0_18], %27 {strides = array<i32>} : memref<1x8x1xf32, #tpu.memory_space<vmem>>, vector<1x8x1xf32>,
    } else {
    }
    %c256_i32 = arith.constant 256 : i32
    %3 = arith.muli %arg1, %c256_i32 : i32
    %c225_i32 = arith.constant 225 : i32
    %4 = arith.subi %c225_i32, %3 : i32
    %5 = tpu.iota {dimensions = array<i32: 1>} : vector<1x256xi32>
    %6 = vector.broadcast %4 : i32 to vector<1x256xi32>
    %7 = arith.cmpi slt, %5, %6 : vector<1x256xi32>
    %c0 = arith.constant 0 : index
    %c0_1 = arith.constant 0 : index
    %8 = vector.load %arg3[%c0, %c0_1] : memref<8x2048xf32, #tpu.memory_space<vmem>>, vector<8x2048xf32>
    %c0_2 = arith.constant 0 : index
    %c0_3 = arith.constant 0 : index
    %c0_4 = arith.constant 0 : index
    %9 = vector.load %arg2[%c0_2, %c0_3, %c0_4] : memref<1x2048x256xf32, #tpu.memory_space<vmem>>, vector<1x2048x256xf32>
    %10 = vector.shape_cast %9 : vector<1x2048x256xf32> to vector<2048x256xf32>
    %cst = arith.constant dense<0.000000e+00> : vector<8x256xf32>
    %11 = tpu.matmul %8, %10, %cst {dimension_numbers = #tpu.dot_dimension_numbers<[1], [0], [0], [1], [0, 0, 1, 1], [], []>} : vector<8x2048xf32>, vector<2048x256xf32>, vector<8x256xf32> -> vector<8x256xf32>
    %cst_5 = arith.constant 0.000000e+00 : f32
    %12 = vector.shape_cast %7 : vector<1x256xi1> to vector<1x256xi1>
    %13 = vector.broadcast %12 : vector<1x256xi1> to vector<8x256xi1>
    %14 = vector.broadcast %cst_5 : f32 to vector<8x256xf32>
    %15 = arith.select %13, %11, %14 : vector<8x256xi1>, vector<8x256xf32>
    %c0_6 = arith.constant 0 : index
    %c0_7 = arith.constant 0 : index
    %c0_8 = arith.constant 0 : index
    %16 = vector.load %arg5[%c0_6, %c0_7, %c0_8] : memref<1x8x1xf32, #tpu.memory_space<vmem>>, vector<1x8x1xf32>
    %17 = vector.shape_cast %16 : vector<1x8x1xf32> to vector<8x1xf32>
    %cst_9 = arith.constant dense<0.000000e+00> : vector<8xf32>
    %18 = vector.multi_reduction <add>, %15, %cst_9 [1] : vector<8x256xf32> to vector<8xf32>
    %19 = vector.shape_cast %18 : vector<8xf32> to vector<8x1xf32>
    %20 = arith.addf %17, %19 : vector<8x1xf32>
    %c0_10 = arith.constant 0 : index
    %c0_11 = arith.constant 0 : index
    %c0_12 = arith.constant 0 : index
    %21 = vector.load %arg5[%c0_10, %c0_11, %c0_12] : memref<1x8x1xf32, #tpu.memory_space<vmem>>, vector<1x8x1xf32>
    %22 = vector.shape_cast %21 : vector<1x8x1xf32> to vector<8x1xf32>
    %23 = vector.shape_cast %20 : vector<8x1xf32> to vector<1x8x1xf32>
    tpu.vector_store %arg5[%c0_10, %c0_11, %c0_12], %23 {strides = array<i32>} : memref<1x8x1xf32, #tpu.memory_space<vmem>>, vector<1x8x1xf32>,
    %c0_i32_13 = arith.constant 0 : i32
    %24 = arith.cmpi eq, %arg1, %c0_i32_13 : i32
    %25 = arith.extui %24 : i1 to i32
    %c0_i32_14 = arith.constant 0 : i32
    %26 = arith.cmpi ne, %25, %c0_i32_14 : i32
    scf.if %26 {
      %c0_15 = arith.constant 0 : index
      %c0_16 = arith.constant 0 : index
      %c0_17 = arith.constant 0 : index
      %27 = vector.load %arg5[%c0_15, %c0_16, %c0_17] : memref<1x8x1xf32, #tpu.memory_space<vmem>>, vector<1x8x1xf32>
      %cst_18 = arith.constant 0.00444444455 : f32
      %28 = vector.broadcast %cst_18 : f32 to vector<1x8x1xf32>
      %29 = arith.mulf %27, %28 : vector<1x8x1xf32>
      %c0_19 = arith.constant 0 : index
      %c0_20 = arith.constant 0 : index
      %c0_21 = arith.constant 0 : index
      %30 = vector.load %arg4[%c0_19, %c0_20, %c0_21] : memref<1x8x1xf32, #tpu.memory_space<vmem>>, vector<1x8x1xf32>
      tpu.vector_store %arg4[%c0_19, %c0_20, %c0_21], %29 {strides = array<i32>} : memref<1x8x1xf32, #tpu.memory_space<vmem>>, vector<1x8x1xf32>,
    } else {
    }
    return
  }
  func.func @transform_0(%arg0: i32, %arg1: i32) -> (i32, i32, i32) {
    %c0_i32 = arith.constant 0 : i32
    %c0_i32_0 = arith.constant 0 : i32
    return %arg0, %c0_i32, %arg1 : i32, i32, i32
  }
  func.func @transform_1(%arg0: i32, %arg1: i32) -> (i32, i32) {
    %c0_i32 = arith.constant 0 : i32
    %c0_i32_0 = arith.constant 0 : i32
    %c0_i32_1 = arith.constant 0 : i32
    return %c0_i32, %c0_i32_0 : i32, i32
  }
  func.func @transform_2(%arg0: i32, %arg1: i32) -> (i32, i32, i32) {
    %c0_i32 = arith.constant 0 : i32
    %c0_i32_0 = arith.constant 0 : i32
    %c0_i32_1 = arith.constant 0 : i32
    return %arg0, %c0_i32, %c0_i32_0 : i32, i32, i32
  }
}

</mosaic_0001>

<bundles_post_ra>
// kernel: tpu_custom_call.1
= control target key start
LH: loop header
LB: loop body
LE: loop exit
PB: predicated region body
PF: predicated region fallthrough
CT: control target
= control target key end

     0   :  { %s1442_s9 = smov 0   ;;  %s1444_s10 = smov 0   ;;  %s2044_s0 = inlined_call_operand.vmem [shape: f32[2,2048,225], index: 0, kind: input, shape index: {}]   ;;  %s2045_s1 = inlined_call_operand.vmem [shape: f32[8,2048], index: 1, kind: input, shape index: {}]   ;;  %s2046_s2 = inlined_call_operand.vmem [shape: f32[2,8,1], index: 2, kind: output, shape index: {}]  }
   0x1   :  { %s1446_s11 = smov 0  }
   0x2 LB: > { %s24_s12 = sadd.s32 1, %s1420_s10  ;;  %p1370_p0 = scmp.ge.s32.totalorder %s1424_s11, 1  ;;  %s1424_s11 = sphi %s1446_s11, %s12_s11   ;;  %s1420_s10 = sphi %s1444_s10, %s2048_s10   ;;  %s1416_s9 = sphi %s1442_s9, %s2047_s9  }
   0x3   : > { %p26_p1 = scmp.ge.s32.totalorder %s24_s12, 2  ;;  %p131_p2 = scmp.lt.s32.totalorder %s1424_s11, 3 }
   0x5   : > { %s2050_s12 = smov (%p26_p1, %s24_s12), 0  ;;  %p132_p3 = pnand %p1370_p0, %p131_p2 }
   0x6   : > { %p157_p4 = scmp.lt.s32.totalorder (!%p132_p3), %s1416_s9, 1 }
   0x7   : > { %135 = sbr.rel (%p132_p3) target bundleno = 631 (0x277), region = 28 }
   0xc   : > { %v185_v0 = vld [vmem:[%s2045_s1 + $0x8] sm:$0xff]  ;;  %v187_v1 = vld [vmem:[%s2045_s1 + $0x18] sm:$0xff]  ;;  %s2052_s9 = smov (!%p157_p4, %s1416_s9), 1  ;;  %vm174_vm0 = vcmask 7168  }
   0xd   : > { %776 = vmatprep.mubr.f32.mxu0 %v185_v0  ;;  %847 = vmatprep.mubr.f32.mxu1 %v187_v1  ;;  %s1376_s17 = sshll.u32 %s2052_s9, 12 }
   0xe   : > { %s1472_s20 = scalar_lea.vmem %s2044_s0, %s1376_s17 }
   0xf   : > { %v231_v2 = vld [vmem:[%s1472_s20 + $0xf8] sm:$0xff]  ;;  %v230_v4 = vld [vmem:[%s1472_s20 + $0xf0] sm:$0xff]  ;;  %v229_v6 = vld [vmem:[%s1472_s20 + $0xe8] sm:$0xff] }
  0x10   : > { %v295_v3 = vld [vmem:[%s1472_s20 + $0x2f8] sm:$0xff]  ;;  %712 = vmatprep.subr.mxu0 %v231_v2  ;;  %v294_v5 = vld [vmem:[%s1472_s20 + $0x2f0] sm:$0xff]  ;;  %v293_v7 = vld [vmem:[%s1472_s20 + $0x2e8] sm:$0xff] }
  0x11   : > { %783 = vmatprep.subr.mxu1 %v295_v3  ;;  %713 = vmatpush1.msra.mxu0 %v230_v4  ;;  %v228_v8 = vld [vmem:[%s1472_s20 + $0xe0] sm:$0xff]  ;;  %v227_v10 = vld [vmem:[%s1472_s20 + $0xd8] sm:$0xff]  ;;  %v226_v12 = vld [vmem:[%s1472_s20 + $0xd0] sm:$0xff] }
  0x12   : > { %784 = vmatpush1.msra.mxu1 %v294_v5  ;;  %v292_v9 = vld [vmem:[%s1472_s20 + $0x2e0] sm:$0xff]  ;;  %714 = vmatprep.subr.mxu0 %v229_v6  ;;  %v291_v11 = vld [vmem:[%s1472_s20 + $0x2d8] sm:$0xff]  ;;  %v290_v13 = vld [vmem:[%s1472_s20 + $0x2d0] sm:$0xff] }
  0x13   : > { %785 = vmatprep.subr.mxu1 %v293_v7  ;;  %715 = vmatpush1.msra.mxu0 %v228_v8  ;;  %v225_v14 = vld [vmem:[%s1472_s20 + $0xc8] sm:$0xff]  ;;  %v224_v16 = vld [vmem:[%s1472_s20 + $0xc0] sm:$0xff]  ;;  %v223_v18 = vld [vmem:[%s1472_s20 + $0xb8] sm:$0xff] }
  0x14   : > { %786 = vmatpush1.msra.mxu1 %v292_v9  ;;  %v289_v15 = vld [vmem:[%s1472_s20 + $0x2c8] sm:$0xff]  ;;  %716 = vmatprep.subr.mxu0 %v227_v10  ;;  %v288_v17 = vld [vmem:[%s1472_s20 + $0x2c0] sm:$0xff]  ;;  %v287_v19 = vld [vmem:[%s1472_s20 + $0x2b8] sm:$0xff] }
  0x15   : > { %787 = vmatprep.subr.mxu1 %v291_v11  ;;  %717 = vmatpush1.msra.mxu0 %v226_v12  ;;  %v222_v20 = vld [vmem:[%s1472_s20 + $0xb0] sm:$0xff]  ;;  %v221_v22 = vld [vmem:[%s1472_s20 + $0xa8] sm:$0xff]  ;;  %v220_v24 = vld [vmem:[%s1472_s20 + $0xa0] sm:$0xff] }
  0x16   : > { %788 = vmatpush1.msra.mxu1 %v290_v13  ;;  %718 = vmatprep.subr.mxu0 %v225_v14  ;;  %v286_v21 = vld [vmem:[%s1472_s20 + $0x2b0] sm:$0xff]  ;;  %v285_v23 = vld [vmem:[%s1472_s20 + $0x2a8] sm:$0xff]  ;;  %v284_v25 = vld [vmem:[%s1472_s20 + $0x2a0] sm:$0xff] }
  0x17   : > { %789 = vmatprep.subr.mxu1 %v289_v15  ;;  %719 = vmatpush1.msra.mxu0 %v224_v16  ;;  %v219_v26 = vld [vmem:[%s1472_s20 + $0x98] sm:$0xff]  ;;  %v218_v28 = vld [vmem:[%s1472_s20 + $0x90] sm:$0xff]  ;;  %v217_v30 = vld [vmem:[%s1472_s20 + $0x88] sm:$0xff] }
  0x18   : > { %790 = vmatpush1.msra.mxu1 %v288_v17  ;;  %720 = vmatprep.subr.mxu0 %v223_v18  ;;  %v283_v27 = vld [vmem:[%s1472_s20 + $0x298] sm:$0xff]  ;;  %v282_v29 = vld [vmem:[%s1472_s20 + $0x290] sm:$0xff]  ;;  %v281_v31 = vld [vmem:[%s1472_s20 + $0x288] sm:$0xff] }
  0x19   : > { %791 = vmatprep.subr.mxu1 %v287_v19  ;;  %721 = vmatpush1.msra.mxu0 %v222_v20  ;;  %v216_v32 = vld [vmem:[%s1472_s20 + $0x80] sm:$0xff]  ;;  %v215_v34 = vld [vmem:[%s1472_s20 + $0x78] sm:$0xff]  ;;  %v214_v36 = vld [vmem:[%s1472_s20 + $0x70] sm:$0xff] }
  0x1a   : > { %792 = vmatpush1.msra.mxu1 %v286_v21  ;;  %722 = vmatprep.subr.mxu0 %v221_v22  ;;  %v280_v33 = vld [vmem:[%s1472_s20 + $0x280] sm:$0xff]  ;;  %v279_v35 = vld [vmem:[%s1472_s20 + $0x278] sm:$0xff]  ;;  %v278_v37 = vld [vmem:[%s1472_s20 + $0x270] sm:$0xff] }
  0x1b   : > { %793 = vmatprep.subr.mxu1 %v285_v23  ;;  %723 = vmatpush1.msra.mxu0 %v220_v24  ;;  %v213_v38 = vld [vmem:[%s1472_s20 + $0x68] sm:$0xff]  ;;  %v212_v40 = vld [vmem:[%s1472_s20 + $0x60] sm:$0xff]  ;;  %v211_v42 = vld [vmem:[%s1472_s20 + $0x58] sm:$0xff] }
  0x1c   : > { %794 = vmatpush1.msra.mxu1 %v284_v25  ;;  %724 = vmatprep.subr.mxu0 %v219_v26  ;;  %v277_v39 = vld [vmem:[%s1472_s20 + $0x268] sm:$0xff]  ;;  %v276_v41 = vld [vmem:[%s1472_s20 + $0x260] sm:$0xff]  ;;  %v275_v43 = vld [vmem:[%s1472_s20 + $0x258] sm:$0xff] }
  0x1d   : > { %795 = vmatprep.subr.mxu1 %v283_v27  ;;  %725 = vmatpush1.msra.mxu0 %v218_v28  ;;  %v210_v44 = vld [vmem:[%s1472_s20 + $0x50] sm:$0xff]  ;;  %v209_v46 = vld [vmem:[%s1472_s20 + $0x48] sm:$0xff]  ;;  %v208_v48 = vld [vmem:[%s1472_s20 + $0x40] sm:$0xff] }
  0x1e   : > { %796 = vmatpush1.msra.mxu1 %v282_v29  ;;  %726 = vmatprep.subr.mxu0 %v217_v30  ;;  %v274_v45 = vld [vmem:[%s1472_s20 + $0x250] sm:$0xff]  ;;  %v273_v47 = vld [vmem:[%s1472_s20 + $0x248] sm:$0xff]  ;;  %v272_v49 = vld [vmem:[%s1472_s20 + $0x240] sm:$0xff] }
  0x1f   : > { %797 = vmatprep.subr.mxu1 %v281_v31  ;;  %727 = vmatpush1.msra.mxu0 %v216_v32  ;;  %v207_v50 = vld [vmem:[%s1472_s20 + $0x38] sm:$0xff]  ;;  %v206_v52 = vld [vmem:[%s1472_s20 + $0x30] sm:$0xff]  ;;  %v205_v54 = vld [vmem:[%s1472_s20 + $0x28] sm:$0xff] }
  0x20   : > { %798 = vmatpush1.msra.mxu1 %v280_v33  ;;  %728 = vmatprep.subr.mxu0 %v215_v34  ;;  %v271_v51 = vld [vmem:[%s1472_s20 + $0x238] sm:$0xff]  ;;  %v270_v53 = vld [vmem:[%s1472_s20 + $0x230] sm:$0xff]  ;;  %v269_v55 = vld [vmem:[%s1472_s20 + $0x228] sm:$0xff] }
  0x21   : > { %799 = vmatprep.subr.mxu1 %v279_v35  ;;  %729 = vmatpush1.msra.mxu0 %v214_v36  ;;  %v204_v56 = vld [vmem:[%s1472_s20 + $0x20] sm:$0xff]  ;;  %v203_v58 = vld [vmem:[%s1472_s20 + $0x18] sm:$0xff]  ;;  %v202_v60 = vld [vmem:[%s1472_s20 + $0x10] sm:$0xff] }
  0x22   : > { %800 = vmatpush1.msra.mxu1 %v278_v37  ;;  %730 = vmatprep.subr.mxu0 %v213_v38  ;;  %v268_v57 = vld [vmem:[%s1472_s20 + $0x220] sm:$0xff]  ;;  %v267_v59 = vld [vmem:[%s1472_s20 + $0x218] sm:$0xff]  ;;  %v266_v61 = vld [vmem:[%s1472_s20 + $0x210] sm:$0xff] }
  0x23   : > { %801 = vmatprep.subr.mxu1 %v277_v39  ;;  %731 = vmatpush1.msra.mxu0 %v212_v40  ;;  %v201_v62 = vld [vmem:[%s1472_s20 + $0x8] sm:$0xff]  ;;  %v200_v0 = vld [vmem:[%s1472_s20] sm:$0xff]  ;;  %v263_v2 = vld [vmem:[%s1472_s20 + $0x1f8] sm:$0xff] }
  0x24   : > { %802 = vmatpush1.msra.mxu1 %v276_v41  ;;  %732 = vmatprep.subr.mxu0 %v211_v42  ;;  %v265_v63 = vld [vmem:[%s1472_s20 + $0x208] sm:$0xff]  ;;  %v264_v1 = vld [vmem:[%s1472_s20 + $0x200] sm:$0xff]  ;;  %v327_v3 = vld [vmem:[%s1472_s20 + $0x3f8] sm:$0xff] }
  0x25   : > { %803 = vmatprep.subr.mxu1 %v275_v43  ;;  %733 = vmatpush1.msra.mxu0 %v210_v44  ;;  %v262_v4 = vld [vmem:[%s1472_s20 + $0x1f0] sm:$0xff]  ;;  %v261_v6 = vld [vmem:[%s1472_s20 + $0x1e8] sm:$0xff]  ;;  %v260_v8 = vld [vmem:[%s1472_s20 + $0x1e0] sm:$0xff] }
  0x26   : > { %804 = vmatpush1.msra.mxu1 %v274_v45  ;;  %734 = vmatprep.subr.mxu0 %v209_v46  ;;  %v326_v5 = vld [vmem:[%s1472_s20 + $0x3f0] sm:$0xff]  ;;  %v325_v7 = vld [vmem:[%s1472_s20 + $0x3e8] sm:$0xff]  ;;  %v324_v9 = vld [vmem:[%s1472_s20 + $0x3e0] sm:$0xff] }
  0x27   : > { %805 = vmatprep.subr.mxu1 %v273_v47  ;;  %735 = vmatpush1.msra.mxu0 %v208_v48  ;;  %v259_v10 = vld [vmem:[%s1472_s20 + $0x1d8] sm:$0xff]  ;;  %v258_v12 = vld [vmem:[%s1472_s20 + $0x1d0] sm:$0xff]  ;;  %v257_v14 = vld [vmem:[%s1472_s20 + $0x1c8] sm:$0xff] }
  0x28   : > { %806 = vmatpush1.msra.mxu1 %v272_v49  ;;  %736 = vmatprep.subr.mxu0 %v207_v50  ;;  %v323_v11 = vld [vmem:[%s1472_s20 + $0x3d8] sm:$0xff]  ;;  %v322_v13 = vld [vmem:[%s1472_s20 + $0x3d0] sm:$0xff]  ;;  %v321_v15 = vld [vmem:[%s1472_s20 + $0x3c8] sm:$0xff] }
  0x29   : > { %807 = vmatprep.subr.mxu1 %v271_v51  ;;  %737 = vmatpush1.msra.mxu0 %v206_v52  ;;  %v256_v16 = vld [vmem:[%s1472_s20 + $0x1c0] sm:$0xff]  ;;  %v255_v18 = vld [vmem:[%s1472_s20 + $0x1b8] sm:$0xff]  ;;  %v254_v20 = vld [vmem:[%s1472_s20 + $0x1b0] sm:$0xff] }
  0x2a   : > { %808 = vmatpush1.msra.mxu1 %v270_v53  ;;  %738 = vmatprep.subr.mxu0 %v205_v54  ;;  %v320_v17 = vld [vmem:[%s1472_s20 + $0x3c0] sm:$0xff]  ;;  %v319_v19 = vld [vmem:[%s1472_s20 + $0x3b8] sm:$0xff]  ;;  %v318_v21 = vld [vmem:[%s1472_s20 + $0x3b0] sm:$0xff] }
  0x2b   : > { %809 = vmatprep.subr.mxu1 %v269_v55  ;;  %739 = vmatpush1.msra.mxu0 %v204_v56  ;;  %v253_v22 = vld [vmem:[%s1472_s20 + $0x1a8] sm:$0xff]  ;;  %v252_v24 = vld [vmem:[%s1472_s20 + $0x1a0] sm:$0xff]  ;;  %v251_v26 = vld [vmem:[%s1472_s20 + $0x198] sm:$0xff] }
  0x2c   : > { %810 = vmatpush1.msra.mxu1 %v268_v57  ;;  %740 = vmatprep.subr.mxu0 %v203_v58  ;;  %v317_v23 = vld [vmem:[%s1472_s20 + $0x3a8] sm:$0xff]  ;;  %v316_v25 = vld [vmem:[%s1472_s20 + $0x3a0] sm:$0xff]  ;;  %v315_v27 = vld [vmem:[%s1472_s20 + $0x398] sm:$0xff] }
  0x2d   : > { %811 = vmatprep.subr.mxu1 %v267_v59  ;;  %741 = vmatpush1.msra.mxu0 %v202_v60  ;;  %v250_v28 = vld [vmem:[%s1472_s20 + $0x190] sm:$0xff]  ;;  %v249_v30 = vld [vmem:[%s1472_s20 + $0x188] sm:$0xff]  ;;  %v248_v32 = vld [vmem:[%s1472_s20 + $0x180] sm:$0xff] }
  0x2e   : > { %812 = vmatpush1.msra.mxu1 %v266_v61  ;;  %742 = vmatprep.subr.mxu0 %v201_v62  ;;  %v314_v29 = vld [vmem:[%s1472_s20 + $0x390] sm:$0xff]  ;;  %v313_v31 = vld [vmem:[%s1472_s20 + $0x388] sm:$0xff]  ;;  %v312_v33 = vld [vmem:[%s1472_s20 + $0x380] sm:$0xff] }
  0x2f   : > { %813 = vmatprep.subr.mxu1 %v265_v63  ;;  %743 = vmatpush1.msra.mxu0 %v200_v0  ;;  %v247_v34 = vld [vmem:[%s1472_s20 + $0x178] sm:$0xff]  ;;  %v246_v36 = vld [vmem:[%s1472_s20 + $0x170] sm:$0xff]  ;;  %v245_v38 = vld [vmem:[%s1472_s20 + $0x168] sm:$0xff] }
  0x30   : > { %814 = vmatpush1.msra.mxu1 %v264_v1  ;;  %744 = vmatprep.subr.mxu0 %v263_v2  ;;  %v311_v35 = vld [vmem:[%s1472_s20 + $0x378] sm:$0xff]  ;;  %v310_v37 = vld [vmem:[%s1472_s20 + $0x370] sm:$0xff]  ;;  %v309_v39 = vld [vmem:[%s1472_s20 + $0x368] sm:$0xff] }
  0x31   : > { %815 = vmatprep.subr.mxu1 %v327_v3  ;;  %745 = vmatpush2.msra.mxu0 %v262_v4  ;;  %v244_v40 = vld [vmem:[%s1472_s20 + $0x160] sm:$0xff]  ;;  %v243_v42 = vld [vmem:[%s1472_s20 + $0x158] sm:$0xff]  ;;  %v242_v44 = vld [vmem:[%s1472_s20 + $0x150] sm:$0xff] }
  0x32   : > { %816 = vmatpush2.msra.mxu1 %v326_v5  ;;  %746 = vmatprep.subr.mxu0 %v261_v6  ;;  %v308_v41 = vld [vmem:[%s1472_s20 + $0x360] sm:$0xff]  ;;  %v307_v43 = vld [vmem:[%s1472_s20 + $0x358] sm:$0xff]  ;;  %v306_v45 = vld [vmem:[%s1472_s20 + $0x350] sm:$0xff] }
  0x33   : > { %817 = vmatprep.subr.mxu1 %v325_v7  ;;  %747 = vmatpush2.msra.mxu0 %v260_v8  ;;  %v241_v46 = vld [vmem:[%s1472_s20 + $0x148] sm:$0xff]  ;;  %v240_v48 = vld [vmem:[%s1472_s20 + $0x140] sm:$0xff]  ;;  %v239_v50 = vld [vmem:[%s1472_s20 + $0x138] sm:$0xff] }
  0x34   : > { %818 = vmatpush2.msra.mxu1 %v324_v9  ;;  %748 = vmatprep.subr.mxu0 %v259_v10  ;;  %v305_v47 = vld [vmem:[%s1472_s20 + $0x348] sm:$0xff]  ;;  %v304_v49 = vld [vmem:[%s1472_s20 + $0x340] sm:$0xff]  ;;  %v303_v51 = vld [vmem:[%s1472_s20 + $0x338] sm:$0xff] }
  0x35   : > { %819 = vmatprep.subr.mxu1 %v323_v11  ;;  %749 = vmatpush2.msra.mxu0 %v258_v12  ;;  %v238_v52 = vld [vmem:[%s1472_s20 + $0x130] sm:$0xff]  ;;  %v237_v54 = vld [vmem:[%s1472_s20 + $0x128] sm:$0xff]  ;;  %v236_v56 = vld [vmem:[%s1472_s20 + $0x120] sm:$0xff] }
  0x36   : > { %820 = vmatpush2.msra.mxu1 %v322_v13  ;;  %750 = vmatprep.subr.mxu0 %v257_v14  ;;  %v302_v53 = vld [vmem:[%s1472_s20 + $0x330] sm:$0xff]  ;;  %v301_v55 = vld [vmem:[%s1472_s20 + $0x328] sm:$0xff]  ;;  %v300_v57 = vld [vmem:[%s1472_s20 + $0x320] sm:$0xff] }
  0x37   : > { %821 = vmatprep.subr.mxu1 %v321_v15  ;;  %751 = vmatpush2.msra.mxu0 %v256_v16  ;;  %v235_v58 = vld [vmem:[%s1472_s20 + $0x118] sm:$0xff]  ;;  %v234_v60 = vld [vmem:[%s1472_s20 + $0x110] sm:$0xff]  ;;  %v233_v62 = vld [vmem:[%s1472_s20 + $0x108] sm:$0xff] }
  0x38   : > { %822 = vmatpush2.msra.mxu1 %v320_v17  ;;  %752 = vmatprep.subr.mxu0 %v255_v18  ;;  %v299_v59 = vld [vmem:[%s1472_s20 + $0x318] sm:$0xff]  ;;  %v298_v61 = vld [vmem:[%s1472_s20 + $0x310] sm:$0xff]  ;;  %v297_v63 = vld [vmem:[%s1472_s20 + $0x308] sm:$0xff] }
  0x39   : > { %823 = vmatprep.subr.mxu1 %v319_v19  ;;  %753 = vmatpush2.msra.mxu0 %v254_v20  ;;  %v232_v0 = vld [vmem:[%s1472_s20 + $0x100] sm:$0xff]  ;;  %v186_v3 = vld [vmem:[%s2045_s1 + $0x10] sm:$0xff]  ;;  %v359_v4 = vld [vmem:[%s1472_s20 + $0x4f8] sm:$0xff] }
  0x3a   : > { %824 = vmatpush2.msra.mxu1 %v318_v21  ;;  %754 = vmatprep.subr.mxu0 %v253_v22  ;;  %v296_v1 = vld [vmem:[%s1472_s20 + $0x300] sm:$0xff]  ;;  %v423_v5 = vld [vmem:[%s1472_s20 + $0x6f8] sm:$0xff]  ;;  %v358_v6 = vld [vmem:[%s1472_s20 + $0x4f0] sm:$0xff] }
  0x3b   : > { %825 = vmatprep.subr.mxu1 %v317_v23  ;;  %755 = vmatpush2.msra.mxu0 %v252_v24  ;;  %v184_v2 = vld [vmem:[%s2045_s1] sm:$0xff]  ;;  %v422_v7 = vld [vmem:[%s1472_s20 + $0x6f0] sm:$0xff]  ;;  %v357_v8 = vld [vmem:[%s1472_s20 + $0x4e8] sm:$0xff] }
  0x3c   : > { %826 = vmatpush2.msra.mxu1 %v316_v25  ;;  %756 = vmatprep.subr.mxu0 %v251_v26  ;;  %v421_v9 = vld [vmem:[%s1472_s20 + $0x6e8] sm:$0xff]  ;;  %v356_v10 = vld [vmem:[%s1472_s20 + $0x4e0] sm:$0xff]  ;;  %v355_v12 = vld [vmem:[%s1472_s20 + $0x4d8] sm:$0xff] }
  0x3d   : > { %827 = vmatprep.subr.mxu1 %v315_v27  ;;  %757 = vmatpush2.msra.mxu0 %v250_v28  ;;  %v420_v11 = vld [vmem:[%s1472_s20 + $0x6e0] sm:$0xff]  ;;  %v419_v13 = vld [vmem:[%s1472_s20 + $0x6d8] sm:$0xff]  ;;  %v354_v14 = vld [vmem:[%s1472_s20 + $0x4d0] sm:$0xff] }
  0x3e   : > { %828 = vmatpush2.msra.mxu1 %v314_v29  ;;  %758 = vmatprep.subr.mxu0 %v249_v30  ;;  %v418_v15 = vld [vmem:[%s1472_s20 + $0x6d0] sm:$0xff]  ;;  %v353_v16 = vld [vmem:[%s1472_s20 + $0x4c8] sm:$0xff]  ;;  %v352_v18 = vld [vmem:[%s1472_s20 + $0x4c0] sm:$0xff] }
  0x3f   : > { %829 = vmatprep.subr.mxu1 %v313_v31  ;;  %759 = vmatpush2.msra.mxu0 %v248_v32  ;;  %v417_v17 = vld [vmem:[%s1472_s20 + $0x6c8] sm:$0xff]  ;;  %v416_v19 = vld [vmem:[%s1472_s20 + $0x6c0] sm:$0xff]  ;;  %v351_v20 = vld [vmem:[%s1472_s20 + $0x4b8] sm:$0xff] }
  0x40   : > { %830 = vmatpush2.msra.mxu1 %v312_v33  ;;  %760 = vmatprep.subr.mxu0 %v247_v34  ;;  %v415_v21 = vld [vmem:[%s1472_s20 + $0x6b8] sm:$0xff]  ;;  %v350_v22 = vld [vmem:[%s1472_s20 + $0x4b0] sm:$0xff]  ;;  %v349_v24 = vld [vmem:[%s1472_s20 + $0x4a8] sm:$0xff] }
  0x41   : > { %831 = vmatprep.subr.mxu1 %v311_v35  ;;  %761 = vmatpush2.msra.mxu0 %v246_v36  ;;  %v414_v23 = vld [vmem:[%s1472_s20 + $0x6b0] sm:$0xff]  ;;  %v413_v25 = vld [vmem:[%s1472_s20 + $0x6a8] sm:$0xff]  ;;  %v348_v26 = vld [vmem:[%s1472_s20 + $0x4a0] sm:$0xff] }
  0x42   : > { %832 = vmatpush2.msra.mxu1 %v310_v37  ;;  %762 = vmatprep.subr.mxu0 %v245_v38  ;;  %v412_v27 = vld [vmem:[%s1472_s20 + $0x6a0] sm:$0xff]  ;;  %v347_v28 = vld [vmem:[%s1472_s20 + $0x498] sm:$0xff]  ;;  %v346_v30 = vld [vmem:[%s1472_s20 + $0x490] sm:$0xff] }
  0x43   : > { %833 = vmatprep.subr.mxu1 %v309_v39  ;;  %763 = vmatpush2.msra.mxu0 %v244_v40  ;;  %v411_v29 = vld [vmem:[%s1472_s20 + $0x698] sm:$0xff]  ;;  %v410_v31 = vld [vmem:[%s1472_s20 + $0x690] sm:$0xff]  ;;  %v345_v32 = vld [vmem:[%s1472_s20 + $0x488] sm:$0xff] }
  0x44   : > { %834 = vmatpush2.msra.mxu1 %v308_v41  ;;  %764 = vmatprep.subr.mxu0 %v243_v42  ;;  %v409_v33 = vld [vmem:[%s1472_s20 + $0x688] sm:$0xff]  ;;  %v344_v34 = vld [vmem:[%s1472_s20 + $0x480] sm:$0xff]  ;;  %v343_v36 = vld [vmem:[%s1472_s20 + $0x478] sm:$0xff] }
  0x45   : > { %835 = vmatprep.subr.mxu1 %v307_v43  ;;  %765 = vmatpush2.msra.mxu0 %v242_v44  ;;  %v408_v35 = vld [vmem:[%s1472_s20 + $0x680] sm:$0xff]  ;;  %v407_v37 = vld [vmem:[%s1472_s20 + $0x678] sm:$0xff]  ;;  %v342_v38 = vld [vmem:[%s1472_s20 + $0x470] sm:$0xff] }
  0x46   : > { %836 = vmatpush2.msra.mxu1 %v306_v45  ;;  %766 = vmatprep.subr.mxu0 %v241_v46  ;;  %v406_v39 = vld [vmem:[%s1472_s20 + $0x670] sm:$0xff]  ;;  %v341_v40 = vld [vmem:[%s1472_s20 + $0x468] sm:$0xff]  ;;  %v340_v42 = vld [vmem:[%s1472_s20 + $0x460] sm:$0xff] }
  0x47   : > { %837 = vmatprep.subr.mxu1 %v305_v47  ;;  %767 = vmatpush2.msra.mxu0 %v240_v48  ;;  %v405_v41 = vld [vmem:[%s1472_s20 + $0x668] sm:$0xff]  ;;  %v404_v43 = vld [vmem:[%s1472_s20 + $0x660] sm:$0xff]  ;;  %v339_v44 = vld [vmem:[%s1472_s20 + $0x458] sm:$0xff] }
  0x48   : > { %838 = vmatpush2.msra.mxu1 %v304_v49  ;;  %768 = vmatprep.subr.mxu0 %v239_v50  ;;  %v403_v45 = vld [vmem:[%s1472_s20 + $0x658] sm:$0xff]  ;;  %v338_v46 = vld [vmem:[%s1472_s20 + $0x450] sm:$0xff]  ;;  %v337_v48 = vld [vmem:[%s1472_s20 + $0x448] sm:$0xff] }
  0x49   : > { %839 = vmatprep.subr.mxu1 %v303_v51  ;;  %769 = vmatpush2.msra.mxu0 %v238_v52  ;;  %v402_v47 = vld [vmem:[%s1472_s20 + $0x650] sm:$0xff]  ;;  %v401_v49 = vld [vmem:[%s1472_s20 + $0x648] sm:$0xff]  ;;  %v336_v50 = vld [vmem:[%s1472_s20 + $0x440] sm:$0xff] }
  0x4a   : > { %840 = vmatpush2.msra.mxu1 %v302_v53  ;;  %770 = vmatprep.subr.mxu0 %v237_v54  ;;  %v400_v51 = vld [vmem:[%s1472_s20 + $0x640] sm:$0xff]  ;;  %v335_v52 = vld [vmem:[%s1472_s20 + $0x438] sm:$0xff]  ;;  %v334_v54 = vld [vmem:[%s1472_s20 + $0x430] sm:$0xff] }
  0x4b   : > { %841 = vmatprep.subr.mxu1 %v301_v55  ;;  %771 = vmatpush2.msra.mxu0 %v236_v56  ;;  %v399_v53 = vld [vmem:[%s1472_s20 + $0x638] sm:$0xff]  ;;  %v398_v55 = vld [vmem:[%s1472_s20 + $0x630] sm:$0xff]  ;;  %v333_v56 = vld [vmem:[%s1472_s20 + $0x428] sm:$0xff] }
  0x4c   : > { %842 = vmatpush2.msra.mxu1 %v300_v57  ;;  %772 = vmatprep.subr.mxu0 %v235_v58  ;;  %v397_v57 = vld [vmem:[%s1472_s20 + $0x628] sm:$0xff]  ;;  %v332_v58 = vld [vmem:[%s1472_s20 + $0x420] sm:$0xff] }
  0x4d   : > { %843 = vmatprep.subr.mxu1 %v299_v59  ;;  %773 = vmatpush2.msra.mxu0 %v234_v60  ;;  %v396_v59 = vld [vmem:[%s1472_s20 + $0x620] sm:$0xff]  ;;  %v331_v60 = vld [vmem:[%s1472_s20 + $0x418] sm:$0xff] }
  0x4e   : > { %844 = vmatpush2.msra.mxu1 %v298_v61  ;;  %774 = vmatprep.subr.mxu0 %v233_v62  ;;  %v395_v61 = vld [vmem:[%s1472_s20 + $0x618] sm:$0xff]  ;;  %v330_v62 = vld [vmem:[%s1472_s20 + $0x410] sm:$0xff] }
  0x4f   : > { %845 = vmatprep.subr.mxu1 %v297_v63  ;;  %775 = vmatpush2.msra.mxu0 %v232_v0  ;;  %v394_v63 = vld [vmem:[%s1472_s20 + $0x610] sm:$0xff]  ;;  %v329_v0 = vld [vmem:[%s1472_s20 + $0x408] sm:$0xff] }
  0x50   : > { %846 = vmatpush2.msra.mxu1 %v296_v1  ;;  %777 = vmatmul.mubr.f32.vlgmr.msra.gmra.mxu0 %v184_v2  ;;  %v393_v1 = vld [vmem:[%s1472_s20 + $0x608] sm:$0xff]  ;;  %v328_v2 = vld [vmem:[%s1472_s20 + $0x400] sm:$0xff] }
  0x51   : > { %848 = vmatmul.mubr.f32.vlgmr.msra.gmra.mxu1 %v186_v3  ;;  %854 = vmatprep.subr.mxu0 %v359_v4  ;;  %v392_v3 = vld [vmem:[%s1472_s20 + $0x600] sm:$0xff]  ;;  %v391_v4 = vld [vmem:[%s1472_s20 + $0x5f8] sm:$0xff] }
  0x52   : > { %925 = vmatprep.subr.mxu1 %v423_v5  ;;  %855 = vmatpush1.msra.mxu0 %v358_v6  ;;  %v455_v5 = vld [vmem:[%s1472_s20 + $0x7f8] sm:$0xff]  ;;  %v390_v6 = vld [vmem:[%s1472_s20 + $0x5f0] sm:$0xff] }
  0x53   : > { %926 = vmatpush1.msra.mxu1 %v422_v7  ;;  %856 = vmatprep.subr.mxu0 %v357_v8  ;;  %v454_v7 = vld [vmem:[%s1472_s20 + $0x7f0] sm:$0xff]  ;;  %v389_v8 = vld [vmem:[%s1472_s20 + $0x5e8] sm:$0xff] }
  0x54   : > { %927 = vmatprep.subr.mxu1 %v421_v9  ;;  %857 = vmatpush1.msra.mxu0 %v356_v10  ;;  %v453_v9 = vld [vmem:[%s1472_s20 + $0x7e8] sm:$0xff]  ;;  %v388_v10 = vld [vmem:[%s1472_s20 + $0x5e0] sm:$0xff] }
  0x55   : > { %928 = vmatpush1.msra.mxu1 %v420_v11  ;;  %858 = vmatprep.subr.mxu0 %v355_v12  ;;  %v452_v11 = vld [vmem:[%s1472_s20 + $0x7e0] sm:$0xff]  ;;  %v387_v12 = vld [vmem:[%s1472_s20 + $0x5d8] sm:$0xff] }
  0x56   : > { %929 = vmatprep.subr.mxu1 %v419_v13  ;;  %859 = vmatpush1.msra.mxu0 %v354_v14  ;;  %v451_v13 = vld [vmem:[%s1472_s20 + $0x7d8] sm:$0xff]  ;;  %v386_v14 = vld [vmem:[%s1472_s20 + $0x5d0] sm:$0xff] }
  0x57   : > { %930 = vmatpush1.msra.mxu1 %v418_v15  ;;  %860 = vmatprep.subr.mxu0 %v353_v16  ;;  %v450_v15 = vld [vmem:[%s1472_s20 + $0x7d0] sm:$0xff]  ;;  %v385_v16 = vld [vmem:[%s1472_s20 + $0x5c8] sm:$0xff] }
  0x58   : > { %931 = vmatprep.subr.mxu1 %v417_v17  ;;  %861 = vmatpush1.msra.mxu0 %v352_v18  ;;  %v449_v17 = vld [vmem:[%s1472_s20 + $0x7c8] sm:$0xff]  ;;  %v384_v18 = vld [vmem:[%s1472_s20 + $0x5c0] sm:$0xff] }
  0x59   : > { %932 = vmatpush1.msra.mxu1 %v416_v19  ;;  %862 = vmatprep.subr.mxu0 %v351_v20  ;;  %v448_v19 = vld [vmem:[%s1472_s20 + $0x7c0] sm:$0xff]  ;;  %v383_v20 = vld [vmem:[%s1472_s20 + $0x5b8] sm:$0xff] }
  0x5a   : > { %933 = vmatprep.subr.mxu1 %v415_v21  ;;  %863 = vmatpush1.msra.mxu0 %v350_v22  ;;  %v447_v21 = vld [vmem:[%s1472_s20 + $0x7b8] sm:$0xff]  ;;  %v382_v22 = vld [vmem:[%s1472_s20 + $0x5b0] sm:$0xff] }
  0x5b   : > { %934 = vmatpush1.msra.mxu1 %v414_v23  ;;  %864 = vmatprep.subr.mxu0 %v349_v24  ;;  %v446_v23 = vld [vmem:[%s1472_s20 + $0x7b0] sm:$0xff]  ;;  %v381_v24 = vld [vmem:[%s1472_s20 + $0x5a8] sm:$0xff] }
  0x5c   : > { %935 = vmatprep.subr.mxu1 %v413_v25  ;;  %865 = vmatpush1.msra.mxu0 %v348_v26  ;;  %v445_v25 = vld [vmem:[%s1472_s20 + $0x7a8] sm:$0xff]  ;;  %v380_v26 = vld [vmem:[%s1472_s20 + $0x5a0] sm:$0xff] }
  0x5d   : > { %936 = vmatpush1.msra.mxu1 %v412_v27  ;;  %866 = vmatprep.subr.mxu0 %v347_v28  ;;  %v444_v27 = vld [vmem:[%s1472_s20 + $0x7a0] sm:$0xff]  ;;  %v379_v28 = vld [vmem:[%s1472_s20 + $0x598] sm:$0xff] }
  0x5e   : > { %937 = vmatprep.subr.mxu1 %v411_v29  ;;  %867 = vmatpush1.msra.mxu0 %v346_v30  ;;  %v443_v29 = vld [vmem:[%s1472_s20 + $0x798] sm:$0xff]  ;;  %v378_v30 = vld [vmem:[%s1472_s20 + $0x590] sm:$0xff] }
  0x5f   : > { %938 = vmatpush1.msra.mxu1 %v410_v31  ;;  %868 = vmatprep.subr.mxu0 %v345_v32  ;;  %v442_v31 = vld [vmem:[%s1472_s20 + $0x790] sm:$0xff]  ;;  %v377_v32 = vld [vmem:[%s1472_s20 + $0x588] sm:$0xff] }
  0x60   : > { %939 = vmatprep.subr.mxu1 %v409_v33  ;;  %869 = vmatpush1.msra.mxu0 %v344_v34  ;;  %v441_v33 = vld [vmem:[%s1472_s20 + $0x788] sm:$0xff]  ;;  %v376_v34 = vld [vmem:[%s1472_s20 + $0x580] sm:$0xff] }
  0x61   : > { %940 = vmatpush1.msra.mxu1 %v408_v35  ;;  %870 = vmatprep.subr.mxu0 %v343_v36  ;;  %v440_v35 = vld [vmem:[%s1472_s20 + $0x780] sm:$0xff]  ;;  %v375_v36 = vld [vmem:[%s1472_s20 + $0x578] sm:$0xff] }
  0x62   : > { %941 = vmatprep.subr.mxu1 %v407_v37  ;;  %871 = vmatpush1.msra.mxu0 %v342_v38  ;;  %v439_v37 = vld [vmem:[%s1472_s20 + $0x778] sm:$0xff]  ;;  %v374_v38 = vld [vmem:[%s1472_s20 + $0x570] sm:$0xff] }
  0x63   : > { %942 = vmatpush1.msra.mxu1 %v406_v39  ;;  %872 = vmatprep.subr.mxu0 %v341_v40  ;;  %v438_v39 = vld [vmem:[%s1472_s20 + $0x770] sm:$0xff]  ;;  %v373_v40 = vld [vmem:[%s1472_s20 + $0x568] sm:$0xff] }
  0x64   : > { %943 = vmatprep.subr.mxu1 %v405_v41  ;;  %873 = vmatpush1.msra.mxu0 %v340_v42  ;;  %v437_v41 = vld [vmem:[%s1472_s20 + $0x768] sm:$0xff]  ;;  %v372_v42 = vld [vmem:[%s1472_s20 + $0x560] sm:$0xff] }
  0x65   : > { %944 = vmatpush1.msra.mxu1 %v404_v43  ;;  %874 = vmatprep.subr.mxu0 %v339_v44  ;;  %v436_v43 = vld [vmem:[%s1472_s20 + $0x760] sm:$0xff]  ;;  %v371_v44 = vld [vmem:[%s1472_s20 + $0x558] sm:$0xff] }
  0x66   : > { %945 = vmatprep.subr.mxu1 %v403_v45  ;;  %875 = vmatpush1.msra.mxu0 %v338_v46  ;;  %v435_v45 = vld [vmem:[%s1472_s20 + $0x758] sm:$0xff]  ;;  %v370_v46 = vld [vmem:[%s1472_s20 + $0x550] sm:$0xff] }
  0x67   : > { %946 = vmatpush1.msra.mxu1 %v402_v47  ;;  %876 = vmatprep.subr.mxu0 %v337_v48  ;;  %v434_v47 = vld [vmem:[%s1472_s20 + $0x750] sm:$0xff]  ;;  %v369_v48 = vld [vmem:[%s1472_s20 + $0x548] sm:$0xff] }
  0x68   : > { %947 = vmatprep.subr.mxu1 %v401_v49  ;;  %877 = vmatpush1.msra.mxu0 %v336_v50  ;;  %v433_v49 = vld [vmem:[%s1472_s20 + $0x748] sm:$0xff]  ;;  %v368_v50 = vld [vmem:[%s1472_s20 + $0x540] sm:$0xff] }
  0x69   : > { %948 = vmatpush1.msra.mxu1 %v400_v51  ;;  %878 = vmatprep.subr.mxu0 %v335_v52  ;;  %v432_v51 = vld [vmem:[%s1472_s20 + $0x740] sm:$0xff]  ;;  %v367_v52 = vld [vmem:[%s1472_s20 + $0x538] sm:$0xff] }
  0x6a   : > { %949 = vmatprep.subr.mxu1 %v399_v53  ;;  %879 = vmatpush1.msra.mxu0 %v334_v54  ;;  %v431_v53 = vld [vmem:[%s1472_s20 + $0x738] sm:$0xff]  ;;  %v366_v54 = vld [vmem:[%s1472_s20 + $0x530] sm:$0xff] }
  0x6b   : > { %950 = vmatpush1.msra.mxu1 %v398_v55  ;;  %880 = vmatprep.subr.mxu0 %v333_v56  ;;  %v430_v55 = vld [vmem:[%s1472_s20 + $0x730] sm:$0xff]  ;;  %v365_v56 = vld [vmem:[%s1472_s20 + $0x528] sm:$0xff] }
  0x6c   : > { %951 = vmatprep.subr.mxu1 %v397_v57  ;;  %881 = vmatpush1.msra.mxu0 %v332_v58  ;;  %v429_v57 = vld [vmem:[%s1472_s20 + $0x728] sm:$0xff]  ;;  %v364_v58 = vld [vmem:[%s1472_s20 + $0x520] sm:$0xff] }
  0x6d   : > { %952 = vmatpush1.msra.mxu1 %v396_v59  ;;  %882 = vmatprep.subr.mxu0 %v331_v60  ;;  %v428_v59 = vld [vmem:[%s1472_s20 + $0x720] sm:$0xff]  ;;  %v363_v60 = vld [vmem:[%s1472_s20 + $0x518] sm:$0xff] }
  0x6e   : > { %953 = vmatprep.subr.mxu1 %v395_v61  ;;  %883 = vmatpush1.msra.mxu0 %v330_v62  ;;  %v427_v61 = vld [vmem:[%s1472_s20 + $0x718] sm:$0xff]  ;;  %v362_v62 = vld [vmem:[%s1472_s20 + $0x510] sm:$0xff] }
  0x6f   : > { %954 = vmatpush1.msra.mxu1 %v394_v63  ;;  %884 = vmatprep.subr.mxu0 %v329_v0  ;;  %v426_v63 = vld [vmem:[%s1472_s20 + $0x710] sm:$0xff]  ;;  %v361_v0 = vld [vmem:[%s1472_s20 + $0x508] sm:$0xff] }
  0x70   : > { %955 = vmatprep.subr.mxu1 %v393_v1  ;;  %885 = vmatpush1.msra.mxu0 %v328_v2  ;;  %v425_v1 = vld [vmem:[%s1472_s20 + $0x708] sm:$0xff]  ;;  %v360_v2 = vld [vmem:[%s1472_s20 + $0x500] sm:$0xff] }
  0x71   : > { %956 = vmatpush1.msra.mxu1 %v392_v3  ;;  %886 = vmatprep.subr.mxu0 %v391_v4  ;;  %v189_v3 = vld [vmem:[%s2045_s1 + $0x28] sm:$0xff]  ;;  %v424_v4 = vld [vmem:[%s1472_s20 + $0x700] sm:$0xff] }
  0x72   : > { %957 = vmatprep.subr.mxu1 %v455_v5  ;;  %887 = vmatpush2.msra.mxu0 %v390_v6  ;;  %v188_v5 = vld [vmem:[%s2045_s1 + $0x20] sm:$0xff]  ;;  %v191_v6 = vld [vmem:[%s2045_s1 + $0x38] sm:$0xff] }
  0x73   : > { %958 = vmatpush2.msra.mxu1 %v454_v7  ;;  %888 = vmatprep.subr.mxu0 %v389_v8  ;;  %v487_v7 = vld [vmem:[%s1472_s20 + $0x8f8] sm:$0xff] }
  0x74   : > { %959 = vmatprep.subr.mxu1 %v453_v9  ;;  %889 = vmatpush2.msra.mxu0 %v388_v10  ;;  %v551_v8 = vld [vmem:[%s1472_s20 + $0xaf8] sm:$0xff]  ;;  %v190_v9 = vld [vmem:[%s2045_s1 + $0x30] sm:$0xff] }
  0x75   : > { %960 = vmatpush2.msra.mxu1 %v452_v11  ;;  %890 = vmatprep.subr.mxu0 %v387_v12  ;;  %v486_v10 = vld [vmem:[%s1472_s20 + $0x8f0] sm:$0xff]  ;;  %v485_v12 = vld [vmem:[%s1472_s20 + $0x8e8] sm:$0xff] }
  0x76   : > { %961 = vmatprep.subr.mxu1 %v451_v13  ;;  %891 = vmatpush2.msra.mxu0 %v386_v14  ;;  %v550_v11 = vld [vmem:[%s1472_s20 + $0xaf0] sm:$0xff]  ;;  %v549_v13 = vld [vmem:[%s1472_s20 + $0xae8] sm:$0xff]  ;;  %v484_v14 = vld [vmem:[%s1472_s20 + $0x8e0] sm:$0xff] }
  0x77   : > { %962 = vmatpush2.msra.mxu1 %v450_v15  ;;  %892 = vmatprep.subr.mxu0 %v385_v16  ;;  %v548_v15 = vld [vmem:[%s1472_s20 + $0xae0] sm:$0xff]  ;;  %v483_v16 = vld [vmem:[%s1472_s20 + $0x8d8] sm:$0xff] }
  0x78   : > { %963 = vmatprep.subr.mxu1 %v449_v17  ;;  %893 = vmatpush2.msra.mxu0 %v384_v18  ;;  %v547_v17 = vld [vmem:[%s1472_s20 + $0xad8] sm:$0xff]  ;;  %v482_v18 = vld [vmem:[%s1472_s20 + $0x8d0] sm:$0xff] }
  0x79   : > { %964 = vmatpush2.msra.mxu1 %v448_v19  ;;  %894 = vmatprep.subr.mxu0 %v383_v20  ;;  %v546_v19 = vld [vmem:[%s1472_s20 + $0xad0] sm:$0xff]  ;;  %v481_v20 = vld [vmem:[%s1472_s20 + $0x8c8] sm:$0xff] }
  0x7a   : > { %965 = vmatprep.subr.mxu1 %v447_v21  ;;  %895 = vmatpush2.msra.mxu0 %v382_v22  ;;  %v545_v21 = vld [vmem:[%s1472_s20 + $0xac8] sm:$0xff]  ;;  %v480_v22 = vld [vmem:[%s1472_s20 + $0x8c0] sm:$0xff] }
  0x7b   : > { %966 = vmatpush2.msra.mxu1 %v446_v23  ;;  %896 = vmatprep.subr.mxu0 %v381_v24  ;;  %v544_v23 = vld [vmem:[%s1472_s20 + $0xac0] sm:$0xff]  ;;  %v479_v24 = vld [vmem:[%s1472_s20 + $0x8b8] sm:$0xff] }
  0x7c   : > { %967 = vmatprep.subr.mxu1 %v445_v25  ;;  %897 = vmatpush2.msra.mxu0 %v380_v26  ;;  %v543_v25 = vld [vmem:[%s1472_s20 + $0xab8] sm:$0xff]  ;;  %v478_v26 = vld [vmem:[%s1472_s20 + $0x8b0] sm:$0xff] }
  0x7d   : > { %968 = vmatpush2.msra.mxu1 %v444_v27  ;;  %898 = vmatprep.subr.mxu0 %v379_v28  ;;  %v542_v27 = vld [vmem:[%s1472_s20 + $0xab0] sm:$0xff]  ;;  %v477_v28 = vld [vmem:[%s1472_s20 + $0x8a8] sm:$0xff] }
  0x7e   : > { %969 = vmatprep.subr.mxu1 %v443_v29  ;;  %899 = vmatpush2.msra.mxu0 %v378_v30  ;;  %v541_v29 = vld [vmem:[%s1472_s20 + $0xaa8] sm:$0xff]  ;;  %v476_v30 = vld [vmem:[%s1472_s20 + $0x8a0] sm:$0xff] }
  0x7f   : > { %970 = vmatpush2.msra.mxu1 %v442_v31  ;;  %900 = vmatprep.subr.mxu0 %v377_v32  ;;  %v540_v31 = vld [vmem:[%s1472_s20 + $0xaa0] sm:$0xff]  ;;  %v475_v32 = vld [vmem:[%s1472_s20 + $0x898] sm:$0xff] }
  0x80   : > { %971 = vmatprep.subr.mxu1 %v441_v33  ;;  %901 = vmatpush2.msra.mxu0 %v376_v34  ;;  %v539_v33 = vld [vmem:[%s1472_s20 + $0xa98] sm:$0xff]  ;;  %v474_v34 = vld [vmem:[%s1472_s20 + $0x890] sm:$0xff] }
  0x81   : > { %972 = vmatpush2.msra.mxu1 %v440_v35  ;;  %902 = vmatprep.subr.mxu0 %v375_v36  ;;  %v538_v35 = vld [vmem:[%s1472_s20 + $0xa90] sm:$0xff]  ;;  %v473_v36 = vld [vmem:[%s1472_s20 + $0x888] sm:$0xff] }
  0x82   : > { %973 = vmatprep.subr.mxu1 %v439_v37  ;;  %903 = vmatpush2.msra.mxu0 %v374_v38  ;;  %v537_v37 = vld [vmem:[%s1472_s20 + $0xa88] sm:$0xff]  ;;  %v472_v38 = vld [vmem:[%s1472_s20 + $0x880] sm:$0xff] }
  0x83   : > { %974 = vmatpush2.msra.mxu1 %v438_v39  ;;  %904 = vmatprep.subr.mxu0 %v373_v40  ;;  %v536_v39 = vld [vmem:[%s1472_s20 + $0xa80] sm:$0xff]  ;;  %v471_v40 = vld [vmem:[%s1472_s20 + $0x878] sm:$0xff] }
  0x84   : > { %975 = vmatprep.subr.mxu1 %v437_v41  ;;  %905 = vmatpush2.msra.mxu0 %v372_v42  ;;  %v535_v41 = vld [vmem:[%s1472_s20 + $0xa78] sm:$0xff]  ;;  %v470_v42 = vld [vmem:[%s1472_s20 + $0x870] sm:$0xff] }
  0x85   : > { %976 = vmatpush2.msra.mxu1 %v436_v43  ;;  %906 = vmatprep.subr.mxu0 %v371_v44  ;;  %v534_v43 = vld [vmem:[%s1472_s20 + $0xa70] sm:$0xff]  ;;  %v469_v44 = vld [vmem:[%s1472_s20 + $0x868] sm:$0xff] }
  0x86   : > { %977 = vmatprep.subr.mxu1 %v435_v45  ;;  %907 = vmatpush2.msra.mxu0 %v370_v46  ;;  %v533_v45 = vld [vmem:[%s1472_s20 + $0xa68] sm:$0xff]  ;;  %v468_v46 = vld [vmem:[%s1472_s20 + $0x860] sm:$0xff] }
  0x87   : > { %978 = vmatpush2.msra.mxu1 %v434_v47  ;;  %908 = vmatprep.subr.mxu0 %v369_v48  ;;  %v532_v47 = vld [vmem:[%s1472_s20 + $0xa60] sm:$0xff]  ;;  %v467_v48 = vld [vmem:[%s1472_s20 + $0x858] sm:$0xff] }
  0x88   : > { %979 = vmatprep.subr.mxu1 %v433_v49  ;;  %909 = vmatpush2.msra.mxu0 %v368_v50  ;;  %v531_v49 = vld [vmem:[%s1472_s20 + $0xa58] sm:$0xff]  ;;  %v466_v50 = vld [vmem:[%s1472_s20 + $0x850] sm:$0xff] }
  0x89   : > { %980 = vmatpush2.msra.mxu1 %v432_v51  ;;  %910 = vmatprep.subr.mxu0 %v367_v52  ;;  %v530_v51 = vld [vmem:[%s1472_s20 + $0xa50] sm:$0xff]  ;;  %v465_v52 = vld [vmem:[%s1472_s20 + $0x848] sm:$0xff] }
  0x8a   : > { %981 = vmatprep.subr.mxu1 %v431_v53  ;;  %911 = vmatpush2.msra.mxu0 %v366_v54  ;;  %v529_v53 = vld [vmem:[%s1472_s20 + $0xa48] sm:$0xff]  ;;  %v464_v54 = vld [vmem:[%s1472_s20 + $0x840] sm:$0xff] }
  0x8b   : > { %982 = vmatpush2.msra.mxu1 %v430_v55  ;;  %912 = vmatprep.subr.mxu0 %v365_v56  ;;  %v528_v55 = vld [vmem:[%s1472_s20 + $0xa40] sm:$0xff]  ;;  %v463_v56 = vld [vmem:[%s1472_s20 + $0x838] sm:$0xff] }
  0x8c   : > { %983 = vmatprep.subr.mxu1 %v429_v57  ;;  %913 = vmatpush2.msra.mxu0 %v364_v58  ;;  %v527_v57 = vld [vmem:[%s1472_s20 + $0xa38] sm:$0xff]  ;;  %v462_v58 = vld [vmem:[%s1472_s20 + $0x830] sm:$0xff] }
  0x8d   : > { %984 = vmatpush2.msra.mxu1 %v428_v59  ;;  %914 = vmatprep.subr.mxu0 %v363_v60  ;;  %v526_v59 = vld [vmem:[%s1472_s20 + $0xa30] sm:$0xff]  ;;  %v461_v60 = vld [vmem:[%s1472_s20 + $0x828] sm:$0xff] }
  0x8e   : > { %985 = vmatprep.subr.mxu1 %v427_v61  ;;  %915 = vmatpush2.msra.mxu0 %v362_v62  ;;  %v525_v61 = vld [vmem:[%s1472_s20 + $0xa28] sm:$0xff]  ;;  %v460_v62 = vld [vmem:[%s1472_s20 + $0x820] sm:$0xff] }
  0x8f   : > { %986 = vmatpush2.msra.mxu1 %v426_v63  ;;  %916 = vmatprep.subr.mxu0 %v361_v0  ;;  %v524_v63 = vld [vmem:[%s1472_s20 + $0xa20] sm:$0xff]  ;;  %v459_v0 = vld [vmem:[%s1472_s20 + $0x818] sm:$0xff] }
  0x90   : > { %987 = vmatprep.subr.mxu1 %v425_v1  ;;  %917 = vmatpush2.msra.mxu0 %v360_v2  ;;  %v523_v1 = vld [vmem:[%s1472_s20 + $0xa18] sm:$0xff]  ;;  %v458_v2 = vld [vmem:[%s1472_s20 + $0x810] sm:$0xff] }
  0x91   : > { %918 = vmatprep.mubr.f32.mxu0 %v189_v3  ;;  %988 = vmatpush2.msra.mxu1 %v424_v4  ;;  %v522_v3 = vld [vmem:[%s1472_s20 + $0xa10] sm:$0xff]  ;;  %v457_v4 = vld [vmem:[%s1472_s20 + $0x808] sm:$0xff] }
  0x92   : > { %919 = vmatmul.mubr.f32.vlgmr.msra.gmra.mxu0 %v188_v5  ;;  %989 = vmatprep.mubr.f32.mxu1 %v191_v6  ;;  %v521_v5 = vld [vmem:[%s1472_s20 + $0xa08] sm:$0xff]  ;;  %v456_v6 = vld [vmem:[%s1472_s20 + $0x800] sm:$0xff] }
  0x93   : > { %996 = vmatprep.subr.mxu0 %v487_v7  ;;  %1067 = vmatprep.subr.mxu1 %v551_v8  ;;  %v520_v7 = vld [vmem:[%s1472_s20 + $0xa00] sm:$0xff]  ;;  %v519_v8 = vld [vmem:[%s1472_s20 + $0x9f8] sm:$0xff] }
  0x94   : > { %990 = vmatmul.mubr.f32.vlgmr.msra.gmra.mxu1 %v190_v9  ;;  %997 = vmatpush1.msra.mxu0 %v486_v10  ;;  %v583_v9 = vld [vmem:[%s1472_s20 + $0xbf8] sm:$0xff]  ;;  %v518_v10 = vld [vmem:[%s1472_s20 + $0x9f0] sm:$0xff] }
  0x95   : > { %1068 = vmatpush1.msra.mxu1 %v550_v11  ;;  %998 = vmatprep.subr.mxu0 %v485_v12  ;;  %v582_v11 = vld [vmem:[%s1472_s20 + $0xbf0] sm:$0xff]  ;;  %v517_v12 = vld [vmem:[%s1472_s20 + $0x9e8] sm:$0xff] }
  0x96   : > { %1069 = vmatprep.subr.mxu1 %v549_v13  ;;  %999 = vmatpush1.msra.mxu0 %v484_v14  ;;  %v581_v13 = vld [vmem:[%s1472_s20 + $0xbe8] sm:$0xff]  ;;  %v516_v14 = vld [vmem:[%s1472_s20 + $0x9e0] sm:$0xff] }
  0x97   : > { %1070 = vmatpush1.msra.mxu1 %v548_v15  ;;  %1000 = vmatprep.subr.mxu0 %v483_v16  ;;  %v580_v15 = vld [vmem:[%s1472_s20 + $0xbe0] sm:$0xff]  ;;  %v515_v16 = vld [vmem:[%s1472_s20 + $0x9d8] sm:$0xff] }
  0x98   : > { %1071 = vmatprep.subr.mxu1 %v547_v17  ;;  %1001 = vmatpush1.msra.mxu0 %v482_v18  ;;  %v579_v17 = vld [vmem:[%s1472_s20 + $0xbd8] sm:$0xff]  ;;  %v514_v18 = vld [vmem:[%s1472_s20 + $0x9d0] sm:$0xff] }
  0x99   : > { %1072 = vmatpush1.msra.mxu1 %v546_v19  ;;  %1002 = vmatprep.subr.mxu0 %v481_v20  ;;  %v578_v19 = vld [vmem:[%s1472_s20 + $0xbd0] sm:$0xff]  ;;  %v513_v20 = vld [vmem:[%s1472_s20 + $0x9c8] sm:$0xff] }
  0x9a   : > { %1073 = vmatprep.subr.mxu1 %v545_v21  ;;  %1003 = vmatpush1.msra.mxu0 %v480_v22  ;;  %v577_v21 = vld [vmem:[%s1472_s20 + $0xbc8] sm:$0xff]  ;;  %v512_v22 = vld [vmem:[%s1472_s20 + $0x9c0] sm:$0xff] }
  0x9b   : > { %1074 = vmatpush1.msra.mxu1 %v544_v23  ;;  %1004 = vmatprep.subr.mxu0 %v479_v24  ;;  %v576_v23 = vld [vmem:[%s1472_s20 + $0xbc0] sm:$0xff]  ;;  %v511_v24 = vld [vmem:[%s1472_s20 + $0x9b8] sm:$0xff] }
  0x9c   : > { %1075 = vmatprep.subr.mxu1 %v543_v25  ;;  %1005 = vmatpush1.msra.mxu0 %v478_v26  ;;  %v575_v25 = vld [vmem:[%s1472_s20 + $0xbb8] sm:$0xff]  ;;  %v510_v26 = vld [vmem:[%s1472_s20 + $0x9b0] sm:$0xff] }
  0x9d   : > { %1076 = vmatpush1.msra.mxu1 %v542_v27  ;;  %1006 = vmatprep.subr.mxu0 %v477_v28  ;;  %v574_v27 = vld [vmem:[%s1472_s20 + $0xbb0] sm:$0xff]  ;;  %v509_v28 = vld [vmem:[%s1472_s20 + $0x9a8] sm:$0xff] }
  0x9e   : > { %1077 = vmatprep.subr.mxu1 %v541_v29  ;;  %1007 = vmatpush1.msra.mxu0 %v476_v30  ;;  %v573_v29 = vld [vmem:[%s1472_s20 + $0xba8] sm:$0xff]  ;;  %v508_v30 = vld [vmem:[%s1472_s20 + $0x9a0] sm:$0xff] }
  0x9f   : > { %1078 = vmatpush1.msra.mxu1 %v540_v31  ;;  %1008 = vmatprep.subr.mxu0 %v475_v32  ;;  %v572_v31 = vld [vmem:[%s1472_s20 + $0xba0] sm:$0xff]  ;;  %v507_v32 = vld [vmem:[%s1472_s20 + $0x998] sm:$0xff] }
  0xa0   : > { %1079 = vmatprep.subr.mxu1 %v539_v33  ;;  %1009 = vmatpush1.msra.mxu0 %v474_v34  ;;  %v571_v33 = vld [vmem:[%s1472_s20 + $0xb98] sm:$0xff]  ;;  %v506_v34 = vld [vmem:[%s1472_s20 + $0x990] sm:$0xff] }
  0xa1   : > { %1080 = vmatpush1.msra.mxu1 %v538_v35  ;;  %1010 = vmatprep.subr.mxu0 %v473_v36  ;;  %v570_v35 = vld [vmem:[%s1472_s20 + $0xb90] sm:$0xff]  ;;  %v505_v36 = vld [vmem:[%s1472_s20 + $0x988] sm:$0xff] }
  0xa2   : > { %1081 = vmatprep.subr.mxu1 %v537_v37  ;;  %1011 = vmatpush1.msra.mxu0 %v472_v38  ;;  %v569_v37 = vld [vmem:[%s1472_s20 + $0xb88] sm:$0xff]  ;;  %v504_v38 = vld [vmem:[%s1472_s20 + $0x980] sm:$0xff] }
  0xa3   : > { %1082 = vmatpush1.msra.mxu1 %v536_v39  ;;  %1012 = vmatprep.subr.mxu0 %v471_v40  ;;  %v568_v39 = vld [vmem:[%s1472_s20 + $0xb80] sm:$0xff]  ;;  %v503_v40 = vld [vmem:[%s1472_s20 + $0x978] sm:$0xff] }
  0xa4   : > { %1083 = vmatprep.subr.mxu1 %v535_v41  ;;  %1013 = vmatpush1.msra.mxu0 %v470_v42  ;;  %v567_v41 = vld [vmem:[%s1472_s20 + $0xb78] sm:$0xff]  ;;  %v502_v42 = vld [vmem:[%s1472_s20 + $0x970] sm:$0xff] }
  0xa5   : > { %1084 = vmatpush1.msra.mxu1 %v534_v43  ;;  %1014 = vmatprep.subr.mxu0 %v469_v44  ;;  %v566_v43 = vld [vmem:[%s1472_s20 + $0xb70] sm:$0xff]  ;;  %v501_v44 = vld [vmem:[%s1472_s20 + $0x968] sm:$0xff] }
  0xa6   : > { %1085 = vmatprep.subr.mxu1 %v533_v45  ;;  %1015 = vmatpush1.msra.mxu0 %v468_v46  ;;  %v565_v45 = vld [vmem:[%s1472_s20 + $0xb68] sm:$0xff]  ;;  %v500_v46 = vld [vmem:[%s1472_s20 + $0x960] sm:$0xff] }
  0xa7   : > { %1086 = vmatpush1.msra.mxu1 %v532_v47  ;;  %1016 = vmatprep.subr.mxu0 %v467_v48  ;;  %v564_v47 = vld [vmem:[%s1472_s20 + $0xb60] sm:$0xff]  ;;  %v499_v48 = vld [vmem:[%s1472_s20 + $0x958] sm:$0xff] }
  0xa8   : > { %1087 = vmatprep.subr.mxu1 %v531_v49  ;;  %1017 = vmatpush1.msra.mxu0 %v466_v50  ;;  %v563_v49 = vld [vmem:[%s1472_s20 + $0xb58] sm:$0xff]  ;;  %v498_v50 = vld [vmem:[%s1472_s20 + $0x950] sm:$0xff] }
  0xa9   : > { %1088 = vmatpush1.msra.mxu1 %v530_v51  ;;  %1018 = vmatprep.subr.mxu0 %v465_v52  ;;  %v562_v51 = vld [vmem:[%s1472_s20 + $0xb50] sm:$0xff]  ;;  %v497_v52 = vld [vmem:[%s1472_s20 + $0x948] sm:$0xff] }
  0xaa   : > { %1089 = vmatprep.subr.mxu1 %v529_v53  ;;  %1019 = vmatpush1.msra.mxu0 %v464_v54  ;;  %v561_v53 = vld [vmem:[%s1472_s20 + $0xb48] sm:$0xff]  ;;  %v496_v54 = vld [vmem:[%s1472_s20 + $0x940] sm:$0xff] }
  0xab   : > { %1090 = vmatpush1.msra.mxu1 %v528_v55  ;;  %1020 = vmatprep.subr.mxu0 %v463_v56  ;;  %v560_v55 = vld [vmem:[%s1472_s20 + $0xb40] sm:$0xff]  ;;  %v495_v56 = vld [vmem:[%s1472_s20 + $0x938] sm:$0xff] }
  0xac   : > { %1091 = vmatprep.subr.mxu1 %v527_v57  ;;  %1021 = vmatpush1.msra.mxu0 %v462_v58  ;;  %v559_v57 = vld [vmem:[%s1472_s20 + $0xb38] sm:$0xff]  ;;  %v494_v58 = vld [vmem:[%s1472_s20 + $0x930] sm:$0xff] }
  0xad   : > { %1092 = vmatpush1.msra.mxu1 %v526_v59  ;;  %1022 = vmatprep.subr.mxu0 %v461_v60  ;;  %v558_v59 = vld [vmem:[%s1472_s20 + $0xb30] sm:$0xff]  ;;  %v493_v60 = vld [vmem:[%s1472_s20 + $0x928] sm:$0xff] }
  0xae   : > { %1093 = vmatprep.subr.mxu1 %v525_v61  ;;  %1023 = vmatpush1.msra.mxu0 %v460_v62  ;;  %v557_v61 = vld [vmem:[%s1472_s20 + $0xb28] sm:$0xff]  ;;  %v492_v62 = vld [vmem:[%s1472_s20 + $0x920] sm:$0xff] }
  0xaf   : > { %1094 = vmatpush1.msra.mxu1 %v524_v63  ;;  %1024 = vmatprep.subr.mxu0 %v459_v0  ;;  %v556_v63 = vld [vmem:[%s1472_s20 + $0xb20] sm:$0xff]  ;;  %v491_v0 = vld [vmem:[%s1472_s20 + $0x918] sm:$0xff] }
  0xb0   : > { %1095 = vmatprep.subr.mxu1 %v523_v1  ;;  %1025 = vmatpush1.msra.mxu0 %v458_v2  ;;  %v555_v1 = vld [vmem:[%s1472_s20 + $0xb18] sm:$0xff]  ;;  %v490_v2 = vld [vmem:[%s1472_s20 + $0x910] sm:$0xff] }
  0xb1   : > { %1096 = vmatpush1.msra.mxu1 %v522_v3  ;;  %1026 = vmatprep.subr.mxu0 %v457_v4  ;;  %v554_v3 = vld [vmem:[%s1472_s20 + $0xb10] sm:$0xff]  ;;  %v489_v4 = vld [vmem:[%s1472_s20 + $0x908] sm:$0xff] }
  0xb2   : > { %1097 = vmatprep.subr.mxu1 %v521_v5  ;;  %1027 = vmatpush1.msra.mxu0 %v456_v6  ;;  %v553_v5 = vld [vmem:[%s1472_s20 + $0xb08] sm:$0xff]  ;;  %v488_v6 = vld [vmem:[%s1472_s20 + $0x900] sm:$0xff] }
  0xb3   : > { %1098 = vmatpush1.msra.mxu1 %v520_v7  ;;  %1028 = vmatprep.subr.mxu0 %v519_v8  ;;  %v193_v7 = vld [vmem:[%s2045_s1 + $0x48] sm:$0xff]  ;;  %v552_v8 = vld [vmem:[%s1472_s20 + $0xb00] sm:$0xff] }
  0xb4   : > { %1099 = vmatprep.subr.mxu1 %v583_v9  ;;  %1029 = vmatpush2.msra.mxu0 %v518_v10  ;;  %v192_v9 = vld [vmem:[%s2045_s1 + $0x40] sm:$0xff]  ;;  %v195_v10 = vld [vmem:[%s2045_s1 + $0x58] sm:$0xff] }
  0xb5   : > { %1100 = vmatpush2.msra.mxu1 %v582_v11  ;;  %1030 = vmatprep.subr.mxu0 %v517_v12  ;;  %v615_v11 = vld [vmem:[%s1472_s20 + $0xcf8] sm:$0xff] }
  0xb6   : > { %1101 = vmatprep.subr.mxu1 %v581_v13  ;;  %1031 = vmatpush2.msra.mxu0 %v516_v14  ;;  %v679_v12 = vld [vmem:[%s1472_s20 + $0xef8] sm:$0xff]  ;;  %v194_v13 = vld [vmem:[%s2045_s1 + $0x50] sm:$0xff] }
  0xb7   : > { %1102 = vmatpush2.msra.mxu1 %v580_v15  ;;  %1032 = vmatprep.subr.mxu0 %v515_v16  ;;  %v614_v14 = vld [vmem:[%s1472_s20 + $0xcf0] sm:$0xff]  ;;  %v613_v16 = vld [vmem:[%s1472_s20 + $0xce8] sm:$0xff] }
  0xb8   : > { %1103 = vmatprep.subr.mxu1 %v579_v17  ;;  %1033 = vmatpush2.msra.mxu0 %v514_v18  ;;  %v678_v15 = vld [vmem:[%s1472_s20 + $0xef0] sm:$0xff]  ;;  %v677_v17 = vld [vmem:[%s1472_s20 + $0xee8] sm:$0xff]  ;;  %v612_v18 = vld [vmem:[%s1472_s20 + $0xce0] sm:$0xff] }
  0xb9   : > { %1104 = vmatpush2.msra.mxu1 %v578_v19  ;;  %1034 = vmatprep.subr.mxu0 %v513_v20  ;;  %v676_v19 = vld [vmem:[%s1472_s20 + $0xee0] sm:$0xff]  ;;  %v611_v20 = vld [vmem:[%s1472_s20 + $0xcd8] sm:$0xff] }
  0xba   : > { %1105 = vmatprep.subr.mxu1 %v577_v21  ;;  %1035 = vmatpush2.msra.mxu0 %v512_v22  ;;  %v675_v21 = vld [vmem:[%s1472_s20 + $0xed8] sm:$0xff]  ;;  %v610_v22 = vld [vmem:[%s1472_s20 + $0xcd0] sm:$0xff] }
  0xbb   : > { %1106 = vmatpush2.msra.mxu1 %v576_v23  ;;  %1036 = vmatprep.subr.mxu0 %v511_v24  ;;  %v674_v23 = vld [vmem:[%s1472_s20 + $0xed0] sm:$0xff]  ;;  %v609_v24 = vld [vmem:[%s1472_s20 + $0xcc8] sm:$0xff] }
  0xbc   : > { %1107 = vmatprep.subr.mxu1 %v575_v25  ;;  %1037 = vmatpush2.msra.mxu0 %v510_v26  ;;  %v673_v25 = vld [vmem:[%s1472_s20 + $0xec8] sm:$0xff]  ;;  %v608_v26 = vld [vmem:[%s1472_s20 + $0xcc0] sm:$0xff] }
  0xbd   : > { %1108 = vmatpush2.msra.mxu1 %v574_v27  ;;  %1038 = vmatprep.subr.mxu0 %v509_v28  ;;  %v672_v27 = vld [vmem:[%s1472_s20 + $0xec0] sm:$0xff]  ;;  %v607_v28 = vld [vmem:[%s1472_s20 + $0xcb8] sm:$0xff] }
  0xbe   : > { %1109 = vmatprep.subr.mxu1 %v573_v29  ;;  %1039 = vmatpush2.msra.mxu0 %v508_v30  ;;  %v671_v29 = vld [vmem:[%s1472_s20 + $0xeb8] sm:$0xff]  ;;  %v606_v30 = vld [vmem:[%s1472_s20 + $0xcb0] sm:$0xff] }
  0xbf   : > { %1110 = vmatpush2.msra.mxu1 %v572_v31  ;;  %1040 = vmatprep.subr.mxu0 %v507_v32  ;;  %v670_v31 = vld [vmem:[%s1472_s20 + $0xeb0] sm:$0xff]  ;;  %v605_v32 = vld [vmem:[%s1472_s20 + $0xca8] sm:$0xff] }
  0xc0   : > { %1111 = vmatprep.subr.mxu1 %v571_v33  ;;  %1041 = vmatpush2.msra.mxu0 %v506_v34  ;;  %v669_v33 = vld [vmem:[%s1472_s20 + $0xea8] sm:$0xff]  ;;  %v604_v34 = vld [vmem:[%s1472_s20 + $0xca0] sm:$0xff] }
  0xc1   : > { %1112 = vmatpush2.msra.mxu1 %v570_v35  ;;  %1042 = vmatprep.subr.mxu0 %v505_v36  ;;  %v668_v35 = vld [vmem:[%s1472_s20 + $0xea0] sm:$0xff]  ;;  %v603_v36 = vld [vmem:[%s1472_s20 + $0xc98] sm:$0xff] }
  0xc2   : > { %1113 = vmatprep.subr.mxu1 %v569_v37  ;;  %1043 = vmatpush2.msra.mxu0 %v504_v38  ;;  %v667_v37 = vld [vmem:[%s1472_s20 + $0xe98] sm:$0xff]  ;;  %v602_v38 = vld [vmem:[%s1472_s20 + $0xc90] sm:$0xff] }
  0xc3   : > { %1114 = vmatpush2.msra.mxu1 %v568_v39  ;;  %1044 = vmatprep.subr.mxu0 %v503_v40  ;;  %v666_v39 = vld [vmem:[%s1472_s20 + $0xe90] sm:$0xff]  ;;  %v601_v40 = vld [vmem:[%s1472_s20 + $0xc88] sm:$0xff] }
  0xc4   : > { %1115 = vmatprep.subr.mxu1 %v567_v41  ;;  %1045 = vmatpush2.msra.mxu0 %v502_v42  ;;  %v665_v41 = vld [vmem:[%s1472_s20 + $0xe88] sm:$0xff]  ;;  %v600_v42 = vld [vmem:[%s1472_s20 + $0xc80] sm:$0xff] }
  0xc5   : > { %1116 = vmatpush2.msra.mxu1 %v566_v43  ;;  %1046 = vmatprep.subr.mxu0 %v501_v44  ;;  %v664_v43 = vld [vmem:[%s1472_s20 + $0xe80] sm:$0xff]  ;;  %v599_v44 = vld [vmem:[%s1472_s20 + $0xc78] sm:$0xff] }
  0xc6   : > { %1117 = vmatprep.subr.mxu1 %v565_v45  ;;  %1047 = vmatpush2.msra.mxu0 %v500_v46  ;;  %v663_v45 = vld [vmem:[%s1472_s20 + $0xe78] sm:$0xff]  ;;  %v598_v46 = vld [vmem:[%s1472_s20 + $0xc70] sm:$0xff] }
  0xc7   : > { %1118 = vmatpush2.msra.mxu1 %v564_v47  ;;  %1048 = vmatprep.subr.mxu0 %v499_v48  ;;  %v662_v47 = vld [vmem:[%s1472_s20 + $0xe70] sm:$0xff]  ;;  %v597_v48 = vld [vmem:[%s1472_s20 + $0xc68] sm:$0xff] }
  0xc8   : > { %1119 = vmatprep.subr.mxu1 %v563_v49  ;;  %1049 = vmatpush2.msra.mxu0 %v498_v50  ;;  %v661_v49 = vld [vmem:[%s1472_s20 + $0xe68] sm:$0xff]  ;;  %v596_v50 = vld [vmem:[%s1472_s20 + $0xc60] sm:$0xff] }
  0xc9   : > { %1120 = vmatpush2.msra.mxu1 %v562_v51  ;;  %1050 = vmatprep.subr.mxu0 %v497_v52  ;;  %v660_v51 = vld [vmem:[%s1472_s20 + $0xe60] sm:$0xff]  ;;  %v595_v52 = vld [vmem:[%s1472_s20 + $0xc58] sm:$0xff] }
  0xca   : > { %1121 = vmatprep.subr.mxu1 %v561_v53  ;;  %1051 = vmatpush2.msra.mxu0 %v496_v54  ;;  %v659_v53 = vld [vmem:[%s1472_s20 + $0xe58] sm:$0xff]  ;;  %v594_v54 = vld [vmem:[%s1472_s20 + $0xc50] sm:$0xff] }
  0xcb   : > { %1122 = vmatpush2.msra.mxu1 %v560_v55  ;;  %1052 = vmatprep.subr.mxu0 %v495_v56  ;;  %v658_v55 = vld [vmem:[%s1472_s20 + $0xe50] sm:$0xff]  ;;  %v593_v56 = vld [vmem:[%s1472_s20 + $0xc48] sm:$0xff] }
  0xcc   : > { %1123 = vmatprep.subr.mxu1 %v559_v57  ;;  %1053 = vmatpush2.msra.mxu0 %v494_v58  ;;  %v657_v57 = vld [vmem:[%s1472_s20 + $0xe48] sm:$0xff]  ;;  %v592_v58 = vld [vmem:[%s1472_s20 + $0xc40] sm:$0xff] }
  0xcd   : > { %1124 = vmatpush2.msra.mxu1 %v558_v59  ;;  %1054 = vmatprep.subr.mxu0 %v493_v60  ;;  %v656_v59 = vld [vmem:[%s1472_s20 + $0xe40] sm:$0xff]  ;;  %v591_v60 = vld [vmem:[%s1472_s20 + $0xc38] sm:$0xff] }
  0xce   : > { %1125 = vmatprep.subr.mxu1 %v557_v61  ;;  %1055 = vmatpush2.msra.mxu0 %v492_v62  ;;  %v655_v61 = vld [vmem:[%s1472_s20 + $0xe38] sm:$0xff]  ;;  %v590_v62 = vld [vmem:[%s1472_s20 + $0xc30] sm:$0xff] }
  0xcf   : > { %1126 = vmatpush2.msra.mxu1 %v556_v63  ;;  %1056 = vmatprep.subr.mxu0 %v491_v0  ;;  %v654_v63 = vld [vmem:[%s1472_s20 + $0xe30] sm:$0xff]  ;;  %v589_v0 = vld [vmem:[%s1472_s20 + $0xc28] sm:$0xff] }
  0xd0   : > { %1127 = vmatprep.subr.mxu1 %v555_v1  ;;  %1057 = vmatpush2.msra.mxu0 %v490_v2  ;;  %v653_v1 = vld [vmem:[%s1472_s20 + $0xe28] sm:$0xff]  ;;  %v588_v2 = vld [vmem:[%s1472_s20 + $0xc20] sm:$0xff] }
  0xd1   : > { %1128 = vmatpush2.msra.mxu1 %v554_v3  ;;  %1058 = vmatprep.subr.mxu0 %v489_v4  ;;  %v652_v3 = vld [vmem:[%s1472_s20 + $0xe20] sm:$0xff]  ;;  %v587_v4 = vld [vmem:[%s1472_s20 + $0xc18] sm:$0xff] }
  0xd2   : > { %1129 = vmatprep.subr.mxu1 %v553_v5  ;;  %1059 = vmatpush2.msra.mxu0 %v488_v6  ;;  %v651_v5 = vld [vmem:[%s1472_s20 + $0xe18] sm:$0xff]  ;;  %v586_v6 = vld [vmem:[%s1472_s20 + $0xc10] sm:$0xff] }
  0xd3   : > { %1060 = vmatprep.mubr.f32.mxu0 %v193_v7  ;;  %1130 = vmatpush2.msra.mxu1 %v552_v8  ;;  %v650_v7 = vld [vmem:[%s1472_s20 + $0xe10] sm:$0xff]  ;;  %v585_v8 = vld [vmem:[%s1472_s20 + $0xc08] sm:$0xff] }
  0xd4   : > { %1061 = vmatmul.mubr.f32.vlgmr.msra.gmra.mxu0 %v192_v9  ;;  %1131 = vmatprep.mubr.f32.mxu1 %v195_v10  ;;  %v649_v9 = vld [vmem:[%s1472_s20 + $0xe08] sm:$0xff]  ;;  %v584_v10 = vld [vmem:[%s1472_s20 + $0xc00] sm:$0xff] }
  0xd5   : > { %1138 = vmatprep.subr.mxu0 %v615_v11  ;;  %1209 = vmatprep.subr.mxu1 %v679_v12  ;;  %v648_v11 = vld [vmem:[%s1472_s20 + $0xe00] sm:$0xff]  ;;  %v647_v12 = vld [vmem:[%s1472_s20 + $0xdf8] sm:$0xff] }
  0xd6   : > { %1132 = vmatmul.mubr.f32.vlgmr.msra.gmra.mxu1 %v194_v13  ;;  %1139 = vmatpush1.msra.mxu0 %v614_v14  ;;  %v711_v13 = vld [vmem:[%s1472_s20 + $0xff8] sm:$0xff]  ;;  %v646_v14 = vld [vmem:[%s1472_s20 + $0xdf0] sm:$0xff] }
  0xd7   : > { %1210 = vmatpush1.msra.mxu1 %v678_v15  ;;  %1140 = vmatprep.subr.mxu0 %v613_v16  ;;  %v710_v15 = vld [vmem:[%s1472_s20 + $0xff0] sm:$0xff]  ;;  %v645_v16 = vld [vmem:[%s1472_s20 + $0xde8] sm:$0xff] }
  0xd8   : > { %1211 = vmatprep.subr.mxu1 %v677_v17  ;;  %1141 = vmatpush1.msra.mxu0 %v612_v18  ;;  %v709_v17 = vld [vmem:[%s1472_s20 + $0xfe8] sm:$0xff]  ;;  %v644_v18 = vld [vmem:[%s1472_s20 + $0xde0] sm:$0xff] }
  0xd9   : > { %1212 = vmatpush1.msra.mxu1 %v676_v19  ;;  %1142 = vmatprep.subr.mxu0 %v611_v20  ;;  %v708_v19 = vld [vmem:[%s1472_s20 + $0xfe0] sm:$0xff]  ;;  %v643_v20 = vld [vmem:[%s1472_s20 + $0xdd8] sm:$0xff] }
  0xda   : > { %1213 = vmatprep.subr.mxu1 %v675_v21  ;;  %1143 = vmatpush1.msra.mxu0 %v610_v22  ;;  %v707_v21 = vld [vmem:[%s1472_s20 + $0xfd8] sm:$0xff]  ;;  %v642_v22 = vld [vmem:[%s1472_s20 + $0xdd0] sm:$0xff] }
  0xdb   : > { %1214 = vmatpush1.msra.mxu1 %v674_v23  ;;  %1144 = vmatprep.subr.mxu0 %v609_v24  ;;  %v706_v23 = vld [vmem:[%s1472_s20 + $0xfd0] sm:$0xff]  ;;  %v641_v24 = vld [vmem:[%s1472_s20 + $0xdc8] sm:$0xff] }
  0xdc   : > { %1215 = vmatprep.subr.mxu1 %v673_v25  ;;  %1145 = vmatpush1.msra.mxu0 %v608_v26  ;;  %v705_v25 = vld [vmem:[%s1472_s20 + $0xfc8] sm:$0xff]  ;;  %v640_v26 = vld [vmem:[%s1472_s20 + $0xdc0] sm:$0xff] }
  0xdd   : > { %1216 = vmatpush1.msra.mxu1 %v672_v27  ;;  %1146 = vmatprep.subr.mxu0 %v607_v28  ;;  %v704_v27 = vld [vmem:[%s1472_s20 + $0xfc0] sm:$0xff]  ;;  %v639_v28 = vld [vmem:[%s1472_s20 + $0xdb8] sm:$0xff] }
  0xde   : > { %1217 = vmatprep.subr.mxu1 %v671_v29  ;;  %1147 = vmatpush1.msra.mxu0 %v606_v30  ;;  %v703_v29 = vld [vmem:[%s1472_s20 + $0xfb8] sm:$0xff]  ;;  %v638_v30 = vld [vmem:[%s1472_s20 + $0xdb0] sm:$0xff] }
  0xdf   : > { %1218 = vmatpush1.msra.mxu1 %v670_v31  ;;  %1148 = vmatprep.subr.mxu0 %v605_v32  ;;  %v702_v31 = vld [vmem:[%s1472_s20 + $0xfb0] sm:$0xff]  ;;  %v637_v32 = vld [vmem:[%s1472_s20 + $0xda8] sm:$0xff] }
  0xe0   : > { %1219 = vmatprep.subr.mxu1 %v669_v33  ;;  %1149 = vmatpush1.msra.mxu0 %v604_v34  ;;  %v701_v33 = vld [vmem:[%s1472_s20 + $0xfa8] sm:$0xff]  ;;  %v636_v34 = vld [vmem:[%s1472_s20 + $0xda0] sm:$0xff] }
  0xe1   : > { %1220 = vmatpush1.msra.mxu1 %v668_v35  ;;  %1150 = vmatprep.subr.mxu0 %v603_v36  ;;  %v700_v35 = vld [vmem:[%s1472_s20 + $0xfa0] sm:$0xff]  ;;  %v635_v36 = vld [vmem:[%s1472_s20 + $0xd98] sm:$0xff] }
  0xe2   : > { %1221 = vmatprep.subr.mxu1 %v667_v37  ;;  %1151 = vmatpush1.msra.mxu0 %v602_v38  ;;  %v699_v37 = vld [vmem:[%s1472_s20 + $0xf98] sm:$0xff]  ;;  %v634_v38 = vld [vmem:[%s1472_s20 + $0xd90] sm:$0xff] }
  0xe3   : > { %1222 = vmatpush1.msra.mxu1 %v666_v39  ;;  %1152 = vmatprep.subr.mxu0 %v601_v40  ;;  %v698_v39 = vld [vmem:[%s1472_s20 + $0xf90] sm:$0xff]  ;;  %v633_v40 = vld [vmem:[%s1472_s20 + $0xd88] sm:$0xff] }
  0xe4   : > { %1223 = vmatprep.subr.mxu1 %v665_v41  ;;  %1153 = vmatpush1.msra.mxu0 %v600_v42  ;;  %v697_v41 = vld [vmem:[%s1472_s20 + $0xf88] sm:$0xff]  ;;  %v632_v42 = vld [vmem:[%s1472_s20 + $0xd80] sm:$0xff] }
  0xe5   : > { %1224 = vmatpush1.msra.mxu1 %v664_v43  ;;  %1154 = vmatprep.subr.mxu0 %v599_v44  ;;  %v696_v43 = vld [vmem:[%s1472_s20 + $0xf80] sm:$0xff]  ;;  %v631_v44 = vld [vmem:[%s1472_s20 + $0xd78] sm:$0xff] }
  0xe6   : > { %1225 = vmatprep.subr.mxu1 %v663_v45  ;;  %1155 = vmatpush1.msra.mxu0 %v598_v46  ;;  %v695_v45 = vld [vmem:[%s1472_s20 + $0xf78] sm:$0xff]  ;;  %v630_v46 = vld [vmem:[%s1472_s20 + $0xd70] sm:$0xff] }
  0xe7   : > { %1226 = vmatpush1.msra.mxu1 %v662_v47  ;;  %1156 = vmatprep.subr.mxu0 %v597_v48  ;;  %v694_v47 = vld [vmem:[%s1472_s20 + $0xf70] sm:$0xff]  ;;  %v629_v48 = vld [vmem:[%s1472_s20 + $0xd68] sm:$0xff] }
  0xe8   : > { %1227 = vmatprep.subr.mxu1 %v661_v49  ;;  %1157 = vmatpush1.msra.mxu0 %v596_v50  ;;  %v693_v49 = vld [vmem:[%s1472_s20 + $0xf68] sm:$0xff]  ;;  %v628_v50 = vld [vmem:[%s1472_s20 + $0xd60] sm:$0xff] }
  0xe9   : > { %1228 = vmatpush1.msra.mxu1 %v660_v51  ;;  %1158 = vmatprep.subr.mxu0 %v595_v52  ;;  %v692_v51 = vld [vmem:[%s1472_s20 + $0xf60] sm:$0xff]  ;;  %v627_v52 = vld [vmem:[%s1472_s20 + $0xd58] sm:$0xff] }
  0xea   : > { %1229 = vmatprep.subr.mxu1 %v659_v53  ;;  %1159 = vmatpush1.msra.mxu0 %v594_v54  ;;  %v691_v53 = vld [vmem:[%s1472_s20 + $0xf58] sm:$0xff]  ;;  %v626_v54 = vld [vmem:[%s1472_s20 + $0xd50] sm:$0xff] }
  0xeb   : > { %1230 = vmatpush1.msra.mxu1 %v658_v55  ;;  %1160 = vmatprep.subr.mxu0 %v593_v56  ;;  %v690_v55 = vld [vmem:[%s1472_s20 + $0xf50] sm:$0xff]  ;;  %v625_v56 = vld [vmem:[%s1472_s20 + $0xd48] sm:$0xff] }
  0xec   : > { %1231 = vmatprep.subr.mxu1 %v657_v57  ;;  %1161 = vmatpush1.msra.mxu0 %v592_v58  ;;  %v689_v57 = vld [vmem:[%s1472_s20 + $0xf48] sm:$0xff]  ;;  %v624_v58 = vld [vmem:[%s1472_s20 + $0xd40] sm:$0xff] }
  0xed   : > { %1232 = vmatpush1.msra.mxu1 %v656_v59  ;;  %1162 = vmatprep.subr.mxu0 %v591_v60  ;;  %v688_v59 = vld [vmem:[%s1472_s20 + $0xf40] sm:$0xff]  ;;  %v623_v60 = vld [vmem:[%s1472_s20 + $0xd38] sm:$0xff] }
  0xee   : > { %1233 = vmatprep.subr.mxu1 %v655_v61  ;;  %1163 = vmatpush1.msra.mxu0 %v590_v62  ;;  %v687_v61 = vld [vmem:[%s1472_s20 + $0xf38] sm:$0xff]  ;;  %v622_v62 = vld [vmem:[%s1472_s20 + $0xd30] sm:$0xff] }
  0xef   : > { %1234 = vmatpush1.msra.mxu1 %v654_v63  ;;  %1164 = vmatprep.subr.mxu0 %v589_v0  ;;  %v686_v63 = vld [vmem:[%s1472_s20 + $0xf30] sm:$0xff]  ;;  %v621_v0 = vld [vmem:[%s1472_s20 + $0xd28] sm:$0xff] }
  0xf0   : > { %1235 = vmatprep.subr.mxu1 %v653_v1  ;;  %1165 = vmatpush1.msra.mxu0 %v588_v2  ;;  %v685_v1 = vld [vmem:[%s1472_s20 + $0xf28] sm:$0xff]  ;;  %v620_v2 = vld [vmem:[%s1472_s20 + $0xd20] sm:$0xff] }
  0xf1   : > { %1236 = vmatpush1.msra.mxu1 %v652_v3  ;;  %1166 = vmatprep.subr.mxu0 %v587_v4  ;;  %v684_v3 = vld [vmem:[%s1472_s20 + $0xf20] sm:$0xff]  ;;  %v619_v4 = vld [vmem:[%s1472_s20 + $0xd18] sm:$0xff] }
  0xf2   : > { %1237 = vmatprep.subr.mxu1 %v651_v5  ;;  %1167 = vmatpush1.msra.mxu0 %v586_v6  ;;  %v683_v5 = vld [vmem:[%s1472_s20 + $0xf18] sm:$0xff]  ;;  %v618_v6 = vld [vmem:[%s1472_s20 + $0xd10] sm:$0xff] }
  0xf3   : > { %1238 = vmatpush1.msra.mxu1 %v650_v7  ;;  %1168 = vmatprep.subr.mxu0 %v585_v8  ;;  %v682_v7 = vld [vmem:[%s1472_s20 + $0xf10] sm:$0xff]  ;;  %v617_v8 = vld [vmem:[%s1472_s20 + $0xd08] sm:$0xff] }
  0xf4   : > { %1239 = vmatprep.subr.mxu1 %v649_v9  ;;  %1169 = vmatpush1.msra.mxu0 %v584_v10  ;;  %v681_v9 = vld [vmem:[%s1472_s20 + $0xf08] sm:$0xff]  ;;  %v616_v10 = vld [vmem:[%s1472_s20 + $0xd00] sm:$0xff] }
  0xf5   : > { %1240 = vmatpush1.msra.mxu1 %v648_v11  ;;  %1170 = vmatprep.subr.mxu0 %v647_v12  ;;  %v197_v11 = vld [vmem:[%s2045_s1 + $0x68] sm:$0xff]  ;;  %v680_v12 = vld [vmem:[%s1472_s20 + $0xf00] sm:$0xff]  ;;  %s1373_s20 = sshll.u32 %s2052_s9, 3 }
  0xf6   : > { %1241 = vmatprep.subr.mxu1 %v711_v13  ;;  %1171 = vmatpush2.msra.mxu0 %v646_v14  ;;  %v199_v13 = vld [vmem:[%s2045_s1 + $0x78] sm:$0xff]  ;;  %v196_v14 = vld [vmem:[%s2045_s1 + $0x60] sm:$0xff]  ;;  %s169_s28 = scalar_lea.vmem %s2046_s2, %s1373_s20 }
  0xf7   : > { %1242 = vmatpush2.msra.mxu1 %v710_v15  ;;  %1172 = vmatprep.subr.mxu0 %v645_v16  ;;  %v198_v15 = vld [vmem:[%s2045_s1 + $0x70] sm:$0xff]  ;;  %v1426_v16 = vmov 0.0  }
  0xf8   : > { %1243 = vmatprep.subr.mxu1 %v709_v17  ;;  %1173 = vmatpush2.msra.mxu0 %v644_v18  ;;  %175 = vst.msk [vmem:[#allocation2] sm:$0xff] %vm174_vm0, %v1426_v16 }
  0xf9   : > { %1244 = vmatpush2.msra.mxu1 %v708_v19  ;;  %1174 = vmatprep.subr.mxu0 %v643_v20 }
  0xfa   : > { %1245 = vmatprep.subr.mxu1 %v707_v21  ;;  %1175 = vmatpush2.msra.mxu0 %v642_v22 }
  0xfb   : > { %1246 = vmatpush2.msra.mxu1 %v706_v23  ;;  %1176 = vmatprep.subr.mxu0 %v641_v24 }
  0xfc   : > { %1247 = vmatprep.subr.mxu1 %v705_v25  ;;  %1177 = vmatpush2.msra.mxu0 %v640_v26 }
  0xfd   : > { %1248 = vmatpush2.msra.mxu1 %v704_v27  ;;  %1178 = vmatprep.subr.mxu0 %v639_v28 }
  0xfe   : > { %1249 = vmatprep.subr.mxu1 %v703_v29  ;;  %1179 = vmatpush2.msra.mxu0 %v638_v30  ;;  %v178_v30 = vlaneseq }
  0xff   : > { %1250 = vmatpush2.msra.mxu1 %v702_v31  ;;  %1180 = vmatprep.subr.mxu0 %v637_v32 }
 0x100   : > { %1251 = vmatprep.subr.mxu1 %v701_v33  ;;  %1181 = vmatpush2.msra.mxu0 %v636_v34 }
 0x101   : > { %1252 = vmatpush2.msra.mxu1 %v700_v35  ;;  %1182 = vmatprep.subr.mxu0 %v635_v36  ;;  %v179_v36 = vand.u32 127, %v178_v30 }
 0x102   : > { %1253 = vmatprep.subr.mxu1 %v699_v37  ;;  %1183 = vmatpush2.msra.mxu0 %v634_v38 }
 0x103   : > { %1254 = vmatpush2.msra.mxu1 %v698_v39  ;;  %1184 = vmatprep.subr.mxu0 %v633_v40 }
 0x104   : > { %1255 = vmatprep.subr.mxu1 %v697_v41  ;;  %1185 = vmatpush2.msra.mxu0 %v632_v42  ;;  %v180_v42 = vadd.s32 128, %v179_v36 }
 0x105   : > { %1256 = vmatpush2.msra.mxu1 %v696_v43  ;;  %1186 = vmatprep.subr.mxu0 %v631_v44 }
 0x106   : > { %1257 = vmatprep.subr.mxu1 %v695_v45  ;;  %1187 = vmatpush2.msra.mxu0 %v630_v46  ;;  %vm183_vm1 = vcmp.lt.s32.totalorder %v180_v42, 225 }
 0x107   : > { %1258 = vmatpush2.msra.mxu1 %v694_v47  ;;  %1188 = vmatprep.subr.mxu0 %v629_v48 }
 0x108   : > { %1259 = vmatprep.subr.mxu1 %v693_v49  ;;  %1189 = vmatpush2.msra.mxu0 %v628_v50 }
 0x109   : > { %1260 = vmatpush2.msra.mxu1 %v692_v51  ;;  %1190 = vmatprep.subr.mxu0 %v627_v52  ;;  %v1286_v52 = vld [vmem:[#allocation2] sm:$0xff] }
 0x10a   : > { %1261 = vmatprep.subr.mxu1 %v691_v53  ;;  %1191 = vmatpush2.msra.mxu0 %v626_v54 }
 0x10b   : > { %1262 = vmatpush2.msra.mxu1 %v690_v55  ;;  %1192 = vmatprep.subr.mxu0 %v625_v56 }
 0x10c   : > { %1263 = vmatprep.subr.mxu1 %v689_v57  ;;  %1193 = vmatpush2.msra.mxu0 %v624_v58 }
 0x10d   : > { %1264 = vmatpush2.msra.mxu1 %v688_v59  ;;  %1194 = vmatprep.subr.mxu0 %v623_v60 }
 0x10e   : > { %1265 = vmatprep.subr.mxu1 %v687_v61  ;;  %1195 = vmatpush2.msra.mxu0 %v622_v62 }
 0x10f   : > { %1266 = vmatpush2.msra.mxu1 %v686_v63  ;;  %1196 = vmatprep.subr.mxu0 %v621_v0 }
 0x110   : > { %1267 = vmatprep.subr.mxu1 %v685_v1  ;;  %1197 = vmatpush2.msra.mxu0 %v620_v2  ;;  %v778_v17 = vpop.f32.mrf.mxu0 }
 0x111   : > { %1268 = vmatpush2.msra.mxu1 %v684_v3  ;;  %1198 = vmatprep.subr.mxu0 %v619_v4  ;;  %v849_v18 = vpop.f32.mrf.mxu1 }
 0x112   : > { %1269 = vmatprep.subr.mxu1 %v683_v5  ;;  %1199 = vmatpush2.msra.mxu0 %v618_v6  ;;  %v780_v19 = vpop.f32.mrf.mxu0  ;;  %v850_v22 = vadd.f32 %v849_v18, %v778_v17 }
 0x113   : > { %1270 = vmatpush2.msra.mxu1 %v682_v7  ;;  %1200 = vmatprep.subr.mxu0 %v617_v8  ;;  %v851_v21 = vpop.f32.mrf.mxu1 }
 0x114   : > { %1271 = vmatprep.subr.mxu1 %v681_v9  ;;  %1201 = vmatpush2.msra.mxu0 %v616_v10  ;;  %v852_v25 = vadd.f32 %v851_v21, %v780_v19 }
 0x115   : > { %1202 = vmatprep.mubr.f32.mxu0 %v197_v11  ;;  %1272 = vmatpush2.msra.mxu1 %v680_v12 }
 0x116   : > { %1273 = vmatprep.mubr.f32.mxu1 %v199_v13  ;;  %1203 = vmatmul.mubr.f32.vlgmr.msra.gmra.mxu0 %v196_v14 }
 0x117   : > { %1274 = vmatmul.mubr.f32.vlgmr.msra.gmra.mxu1 %v198_v15 }
 0x152   : > { %v920_v20 = vpop.f32.mrf.mxu0 }
 0x153   : > { %v921_v26 = vadd.f32 %v920_v20, %v850_v22 }
 0x154   : > { %v991_v23 = vpop.f32.mrf.mxu1  ;;  %v922_v24 = vpop.f32.mrf.mxu0 }
 0x155   : > { %v923_v28 = vadd.f32 %v922_v24, %v852_v25  ;;  %v992_v31 = vadd.f32 %v991_v23, %v921_v26 }
 0x156   : > { %v993_v29 = vpop.f32.mrf.mxu1 }
 0x157   : > { %v994_v34 = vadd.f32 %v993_v29, %v923_v28 }
 0x194   : > { %v1062_v27 = vpop.f32.mrf.mxu0 }
 0x195   : > { %v1063_v35 = vadd.f32 %v1062_v27, %v992_v31 }
 0x196   : > { %v1133_v32 = vpop.f32.mrf.mxu1  ;;  %v1064_v33 = vpop.f32.mrf.mxu0 }
 0x197   : > { %v1065_v37 = vadd.f32 %v1064_v33, %v994_v34  ;;  %v1134_v39 = vadd.f32 %v1133_v32, %v1063_v35 }
 0x198   : > { %v1135_v38 = vpop.f32.mrf.mxu1 }
 0x199   : > { %v1136_v43 = vadd.f32 %v1135_v38, %v1065_v37 }
 0x1d6   : > { %v1204_v40 = vpop.f32.mrf.mxu0 }
 0x1d7   : > { %v1275_v41 = vpop.f32.mrf.mxu1  ;;  %v1205_v44 = vadd.f32 %v1204_v40, %v1134_v39 }
 0x1d8   : > { %v1206_v45 = vpop.f32.mrf.mxu0 }
 0x1d9   : > { %v1207_v46 = vadd.f32 %v1206_v45, %v1136_v43  ;;  %v1277_v47 = vpop.f32.mrf.mxu1  ;;  %v1276_v49 = vadd.f32 %v1275_v41, %v1205_v44 }
 0x1db   : > { %v1278_v48 = vadd.f32 %v1277_v47, %v1207_v46 }
 0x1dd   : > { %v1285_v50 = vsel %vm183_vm1, %v1278_v48, 0.0 }
 0x1de   : > { %v1287_v51 = vadd.f32 %v1285_v50, %v1276_v49 }
 0x1e0   : > { %1288 = vadd.xlane.f32.xlu0 %v1287_v51 }
 0x269   : > { %v1289_v53 = vpop.xlane.xlu0 %1288 }
 0x26a   : > { %v1290_v54 = vadd.f32 %v1289_v53, %v1286_v52 }
 0x26c   : > { %1292 = vst.msk [vmem:[#allocation2] sm:$0xff] %vm174_vm0, %v1290_v54 }
 0x273   : > { %v1296_v55 = vld [vmem:[#allocation2] sm:$0xff] }
 0x274   : > { %v1297_v56 = vmul.f32 0.0044444446, %v1296_v55 }
 0x276   : > { %1298 = vst.msk [vmem:[%s169_s28] sm:$0xff] %vm174_vm0, %v1297_v56 }
 0x277 PF: > { %s12_s11 = sadd.s32 1, %s1424_s11   ;;  %s2047_s9 = smov %s1420_s10 }
 0x278   : > { %p9_p5 = scmp.ge.s32.totalorder %s12_s11, 4   ;;  %s2048_s10 = smov %s2050_s12 }
 0x27a   :  { %11 = sbr.rel (!%p9_p5) target bundleno = 2 (0x2), region = 66 }

</bundles_post_ra>
